<compile_context>
chip_gen: v6e
topology: v6e:2x2x1
jax: 0.10.0
libtpu: 0.0.40
codegen_flags: <defaults>
</compile_context>

<pallas_src>
import numpy as np

import jax
import jax.numpy as jnp
from jax.experimental import pallas as pl
from jax.experimental.pallas import tpu as pltpu

BN_EPS = 1e-5

# Static per-layer geometry for a 16x16 input: (cin, cout, H(=W), Ho(=Wo)).
# Wo*cout == 128 at every layer, so every activation is a lane-dense
# [N*Ho, 128] matrix that is directly the next layer's input.
_LAYERS = ((3, 16, 16, 8), (16, 32, 8, 4), (32, 64, 4, 2))


def _full_spec(shape):
    nd = len(shape)
    return pl.BlockSpec(shape, lambda i, _nd=nd: (0,) * _nd)


# ---------------------------------------------------------------------------
# Single fused kernel.
# ---------------------------------------------------------------------------
def _simple_cnn_kernel(x_ref, b1_ref, s1_ref, b2_ref, s2_ref, b3_hbm, s3_ref,
                       gam_ref, bet_ref, pool_ref, wfc_hbm, bfc_ref,
                       o_ref, b3_vmem, wfc_vmem, dma_sem):
    # Kick off the layer-3 tap-weight and FC-weight DMAs immediately so their
    # HBM->VMEM traffic overlaps the layer-1/2 compute.
    cp_b3 = pltpu.make_async_copy(b3_hbm, b3_vmem, dma_sem.at[0])
    cp_fc = pltpu.make_async_copy(wfc_hbm, wfc_vmem, dma_sem.at[1])
    cp_b3.start()
    cp_fc.start()

    def conv_bn_relu(x, b_wide, s_big, layer):
        cout = _LAYERS[layer][1]
        wo = 128 // cout
        m = s_big.shape[0]

        # Conv = one wide-K tap matmul + one 0/1 row-selection matmul
        # (stride-2 subsample + zero padding along H).  The three kernel-row
        # blocks of z are stacked along sublanes; all slices/concats here are
        # (8,128)-aligned.
        z = jnp.dot(x, b_wide, preferred_element_type=jnp.float32)        # [NH,384]
        z_stack = jnp.concatenate(
            (z[:, 0:128], z[:, 128:256], z[:, 256:384]), axis=0)          # [3NH,128]
        y = jnp.dot(s_big, z_stack, preferred_element_type=jnp.float32)   # [M,128]

        # BatchNorm2d, training-mode batch statistics (biased variance) over
        # (N, H, W) -- entirely off the MXU.  Lanes are (wo, co) interleaved,
        # so the reduction over the Wo spatial copies of each channel is a
        # log2(Wo)-step lane-roll all-reduce (which also broadcasts the result
        # back to every lane).  The conv bias is omitted: the batch-mean
        # subtraction cancels it exactly.
        def wo_allreduce(v):                     # v: [1, 128]
            step = cout
            while step < 128:
                v = v + pltpu.roll(v, step, 1)
                step *= 2
            return v

        inv_cnt = 1.0 / float(m * wo)
        mean = wo_allreduce(jnp.sum(y, axis=0, keepdims=True)) * inv_cnt
        ey2 = wo_allreduce(jnp.sum(y * y, axis=0, keepdims=True)) * inv_cnt
        var = ey2 - mean * mean                  # biased variance
        scale = gam_ref[layer:layer + 1, :] * jax.lax.rsqrt(var + BN_EPS)
        bias = bet_ref[layer:layer + 1, :] - mean * scale
        return jnp.maximum(y * scale + bias, 0.0)

    a = conv_bn_relu(x_ref[...], b1_ref[...], s1_ref[...], 0)   # [N*8, 128]
    a = conv_bn_relu(a, b2_ref[...], s2_ref[...], 1)            # [N*4, 128]
    cp_b3.wait()
    a = conv_bn_relu(a, b3_vmem[...], s3_ref[...], 2)           # [N*2, 128]

    # AdaptiveAvgPool2d((1,1)) + flatten + Linear: per-sample row average via a
    # tiny matmul, fold the Wo3=2 lane copies of each channel, then one FC
    # matmul against the original (un-tiled) [64, out_dim] weight.
    pooled = jnp.dot(pool_ref[...], a, preferred_element_type=jnp.float32)  # [N,128]
    pooled = pooled[:, 0:64] + pooled[:, 64:128]                            # [N,64]
    cp_fc.wait()
    o_ref[...] = (jnp.dot(pooled, wfc_vmem[...],
                          preferred_element_type=jnp.float32) + bfc_ref[...])


# ---------------------------------------------------------------------------
# Host-side, one-time packing of the parameters into the constant matrices the
# fused kernel consumes (plain numpy on concrete values, not jitted).
# ---------------------------------------------------------------------------
def pack_params(params, batch, in_hw=16):
    assert in_hw == 16, "packing assumes 16x16 input so Wo*Cout == 128 per layer"
    N = int(batch)
    names = ("c1", "c2", "c3")

    packed = {}
    gam = np.zeros((3, 128), np.float32)
    bet = np.zeros((3, 128), np.float32)

    for idx, (name, (cin, cout, H, Ho)) in enumerate(zip(names, _LAYERS)):
        W, Wo = H, Ho
        assert Wo * cout == 128
        w_hwio = np.asarray(params[name]["w"], np.float32)        # [3,3,cin,cout]

        # B_wide [W*cin, 3*128]: column block dy holds the taps of kernel row
        # dy, absorbing the stride-2 subsample + zero padding along W.
        B = np.zeros((3, W * cin, Wo * cout), np.float32)
        for dy in range(3):
            for wo in range(Wo):
                for dx in range(3):
                    w = 2 * wo - 1 + dx                            # padding = 1
                    if 0 <= w < W:
                        B[dy, w * cin:(w + 1) * cin,
                          wo * cout:(wo + 1) * cout] = w_hwio[dy, dx]
        packed[f"b{idx + 1}"] = jnp.asarray(np.concatenate([B[0], B[1], B[2]], 1))

        # S_big [N*Ho, 3*N*H]: output row (n, ho) sums rows h = 2*ho-1+dy
        # (zero padded along H) of the three sublane-stacked tap blocks.
        S = np.zeros((N * Ho, 3 * N * H), np.float32)
        for dy in range(3):
            for n in range(N):
                for ho in range(Ho):
                    h = 2 * ho - 1 + dy                            # padding = 1
                    if 0 <= h < H:
                        S[n * Ho + ho, dy * N * H + n * H + h] = 1.0
        packed[f"s{idx + 1}"] = jnp.asarray(S)

        # NOTE: conv bias params[name]["b"] is intentionally not packed —
        # training-mode BN subtracts the batch mean, which cancels it exactly.
        gam[idx] = np.tile(np.asarray(params[name]["gamma"], np.float32), Wo)
        bet[idx] = np.tile(np.asarray(params[name]["beta"], np.float32), Wo)

    Ho3 = _LAYERS[-1][3]                                           # 2
    packed["gam"] = jnp.asarray(gam)
    packed["bet"] = jnp.asarray(bet)
    # Per-sample row average; the full 1/(Ho3*Wo3) factor is folded in here —
    # the in-kernel lane fold then completes the 2x2 spatial mean.
    packed["ppool"] = jnp.asarray(
        np.kron(np.eye(N, dtype=np.float32), np.ones((1, Ho3), np.float32))
        / float(Ho3 * Ho3))                                        # [N, N*Ho3]
    packed["wfc"] = jnp.asarray(np.asarray(params["fc_w"], np.float32))  # [64,out]
    packed["bfc"] = jnp.asarray(
        np.asarray(params["fc_b"], np.float32).reshape(1, -1))
    return packed


# ---------------------------------------------------------------------------
# Forward pass: one transpose/reshape of the NCHW input + a single pallas_call.
# ---------------------------------------------------------------------------
def simple_cnn_forward(packed, x_nchw):
    n, c, h, w = x_nchw.shape
    assert (c, h, w) == (3, 16, 16)
    # Glue: NCHW -> [N*H, W*C] with columns interleaved as (w, ci) — the layout
    # the packed tap matrices expect.
    x2d = jnp.transpose(x_nchw, (0, 2, 3, 1)).astype(jnp.float32).reshape(n * h, w * c)

    operands = (x2d, packed["b1"], packed["s1"], packed["b2"], packed["s2"],
                packed["b3"], packed["s3"], packed["gam"], packed["bet"],
                packed["ppool"], packed["wfc"], packed["bfc"])
    out_dim = int(packed["bfc"].shape[-1])
    hbm_operands = (5, 10)              # b3, wfc: manual async copy in-kernel

    in_specs = []
    for i, a in enumerate(operands):
        if i in hbm_operands:
            in_specs.append(pl.BlockSpec(memory_space=pl.ANY))
        else:
            in_specs.append(_full_spec(a.shape))

    # Advisory cost hint for XLA scheduling around the single custom call.
    flops = 0
    for b_key, s_key in (("b1", "s1"), ("b2", "s2"), ("b3", "s3")):
        wc, n3 = packed[b_key].shape
        m, k3 = packed[s_key].shape
        nh = k3 // 3
        flops += 2 * nh * wc * n3 + 2 * m * k3 * 128
    np_, nr_ = packed["ppool"].shape
    flops += 2 * np_ * nr_ * 128
    kfc, _ = packed["wfc"].shape
    flops += 2 * np_ * kfc * out_dim
    bytes_accessed = sum(int(np.prod(a.shape)) * 4 for a in operands) + n * out_dim * 4

    return pl.pallas_call(
        _simple_cnn_kernel,
        out_shape=jax.ShapeDtypeStruct((n, out_dim), jnp.float32),
        grid=(1,),
        in_specs=in_specs,
        out_specs=_full_spec((n, out_dim)),
        scratch_shapes=[
            pltpu.VMEM(packed["b3"].shape, jnp.float32),
            pltpu.VMEM(packed["wfc"].shape, jnp.float32),
            pltpu.SemaphoreType.DMA((2,)),
        ],
        compiler_params=pltpu.CompilerParams(dimension_semantics=("arbitrary",)),
        cost_estimate=pl.CostEstimate(flops=int(flops), transcendentals=3 * 128,
                                      bytes_accessed=int(bytes_accessed)),
    )(*operands)


# ---------------------------------------------------------------------------
# Parameter init (conv weights HWIO, fc weight [in, out]) and a pure-JAX
# reference of the PyTorch forward for validation.
# ---------------------------------------------------------------------------
def init_params(key, out_dim=512):
    ks = jax.random.split(key, 12)

    def conv_layer(k0, k1, k2, k3, cin, cout):
        return dict(
            w=jax.random.normal(k0, (3, 3, cin, cout), jnp.float32) * 0.1,
            b=jax.random.normal(k1, (cout,), jnp.float32) * 0.1,
            gamma=1.0 + 0.1 * jax.random.normal(k2, (cout,), jnp.float32),
            beta=0.1 * jax.random.normal(k3, (cout,), jnp.float32),
        )

    return dict(
        c1=conv_layer(ks[0], ks[1], ks[2], ks[3], 3, 16),
        c2=conv_layer(ks[4], ks[5], ks[6], ks[7], 16, 32),
        c3=conv_layer(ks[8], ks[9], ks[10], ks[11], 32, 64),
        fc_w=jax.random.normal(jax.random.fold_in(key, 100), (64, out_dim), jnp.float32) * 0.1,
        fc_b=jax.random.normal(jax.random.fold_in(key, 101), (out_dim,), jnp.float32) * 0.1,
    )


def reference_forward(params, x_nchw):
    x = jnp.transpose(x_nchw, (0, 2, 3, 1)).astype(jnp.float32)   # NHWC
    for name in ("c1", "c2", "c3"):
        p = params[name]
        y = jax.lax.conv_general_dilated(
            x, p["w"], window_strides=(2, 2), padding=((1, 1), (1, 1)),
            dimension_numbers=("NHWC", "HWIO", "NHWC")) + p["b"]
        mean = jnp.mean(y, axis=(0, 1, 2))
        var = jnp.mean((y - mean) ** 2, axis=(0, 1, 2))
        x = jnp.maximum((y - mean) * jax.lax.rsqrt(var + BN_EPS) * p["gamma"]
                        + p["beta"], 0.0)
    pooled = jnp.mean(x, axis=(1, 2))
    return pooled @ params["fc_w"] + params["fc_b"]


if __name__ == "__main__":
    key = jax.random.PRNGKey(0)
    params = init_params(key, out_dim=512)
    x = jax.random.normal(jax.random.fold_in(key, 7), (2, 3, 16, 16), jnp.float32)  # NCHW

    packed = pack_params(params, batch=x.shape[0], in_hw=x.shape[2])   # one-time

    out = jax.block_until_ready(jax.jit(simple_cnn_forward)(packed, x))

    assert out.shape == (2, 512), out.shape
    assert bool(jnp.all(jnp.isfinite(out)))

    # Numerical check against a pure-JAX rendering of the PyTorch forward.
    ref = jax.block_until_ready(jax.jit(reference_forward)(params, x))
    max_err = float(jnp.max(jnp.abs(out - ref)))
    assert max_err < 2e-3, f"max abs error vs reference: {max_err}"

    print("KERNEL_OK")
</pallas_src>

<mosaic_0001>
module attributes {stable_mosaic.version = 11 : i64} {
  func.func @_simple_cnn_kernel(%arg0: i32, %arg1: memref<32x48xf32, #tpu.memory_space<vmem>>, %arg2: memref<48x384xf32, #tpu.memory_space<vmem>>, %arg3: memref<16x96xf32, #tpu.memory_space<vmem>>, %arg4: memref<128x384xf32, #tpu.memory_space<vmem>>, %arg5: memref<8x48xf32, #tpu.memory_space<vmem>>, %arg6: memref<128x384xf32, #tpu.memory_space<any>>, %arg7: memref<4x24xf32, #tpu.memory_space<vmem>>, %arg8: memref<3x128xf32, #tpu.memory_space<vmem>>, %arg9: memref<3x128xf32, #tpu.memory_space<vmem>>, %arg10: memref<2x4xf32, #tpu.memory_space<vmem>>, %arg11: memref<64x512xf32, #tpu.memory_space<any>>, %arg12: memref<1x512xf32, #tpu.memory_space<vmem>>, %arg13: memref<2x512xf32, #tpu.memory_space<vmem>>, %arg14: memref<128x384xf32, #tpu.memory_space<vmem>>, %arg15: memref<64x512xf32, #tpu.memory_space<vmem>>, %arg16: memref<2x!tpu.dma_semaphore, #tpu.memory_space<semaphore_mem>>) attributes {dimension_semantics = [#tpu.dimension_semantics<arbitrary>], iteration_bounds = array<i64: 1>, scalar_prefetch = 0 : i64, scratch_operands = 3 : i64, tpu.core_type = #tpu.core_type<tc>, window_params = [{pipeline_mode = #tpu.pipeline_mode<synchronous>, transform_indices = @transform_0, window_bounds = array<i64: 32, 48>}, {pipeline_mode = #tpu.pipeline_mode<synchronous>, transform_indices = @transform_1, window_bounds = array<i64: 48, 384>}, {pipeline_mode = #tpu.pipeline_mode<synchronous>, transform_indices = @transform_2, window_bounds = array<i64: 16, 96>}, {pipeline_mode = #tpu.pipeline_mode<synchronous>, transform_indices = @transform_3, window_bounds = array<i64: 128, 384>}, {pipeline_mode = #tpu.pipeline_mode<synchronous>, transform_indices = @transform_4, window_bounds = array<i64: 8, 48>}, {}, {pipeline_mode = #tpu.pipeline_mode<synchronous>, transform_indices = @transform_6, window_bounds = array<i64: 4, 24>}, {pipeline_mode = #tpu.pipeline_mode<synchronous>, transform_indices = @transform_7, window_bounds = array<i64: 3, 128>}, {pipeline_mode = #tpu.pipeline_mode<synchronous>, transform_indices = @transform_8, window_bounds = array<i64: 3, 128>}, {pipeline_mode = #tpu.pipeline_mode<synchronous>, transform_indices = @transform_9, window_bounds = array<i64: 2, 4>}, {}, {pipeline_mode = #tpu.pipeline_mode<synchronous>, transform_indices = @transform_11, window_bounds = array<i64: 1, 512>}, {pipeline_mode = #tpu.pipeline_mode<synchronous>, transform_indices = @transform_12, window_bounds = array<i64: 2, 512>}]} {
    %c0_i32 = arith.constant 0 : i32
    %0 = tpu.memref_slice %arg16[%c0_i32] : memref<2x!tpu.dma_semaphore, #tpu.memory_space<semaphore_mem>> -> memref<1x!tpu.dma_semaphore, #tpu.memory_space<semaphore_mem>>
    %1 = tpu.memref_squeeze %0 : memref<1x!tpu.dma_semaphore, #tpu.memory_space<semaphore_mem>> -> memref<!tpu.dma_semaphore, #tpu.memory_space<semaphore_mem>>
    tpu.enqueue_dma source(%arg6 : memref<128x384xf32, #tpu.memory_space<any>>) target(%arg14 : memref<128x384xf32, #tpu.memory_space<vmem>>) target_semaphore(%1 : memref<!tpu.dma_semaphore, #tpu.memory_space<semaphore_mem>>)
    %c1_i32 = arith.constant 1 : i32
    %2 = tpu.memref_slice %arg16[%c1_i32] : memref<2x!tpu.dma_semaphore, #tpu.memory_space<semaphore_mem>> -> memref<1x!tpu.dma_semaphore, #tpu.memory_space<semaphore_mem>>
    %3 = tpu.memref_squeeze %2 : memref<1x!tpu.dma_semaphore, #tpu.memory_space<semaphore_mem>> -> memref<!tpu.dma_semaphore, #tpu.memory_space<semaphore_mem>>
    tpu.enqueue_dma source(%arg11 : memref<64x512xf32, #tpu.memory_space<any>>) target(%arg15 : memref<64x512xf32, #tpu.memory_space<vmem>>) target_semaphore(%3 : memref<!tpu.dma_semaphore, #tpu.memory_space<semaphore_mem>>)
    %c0 = arith.constant 0 : index
    %c0_0 = arith.constant 0 : index
    %4 = vector.load %arg1[%c0, %c0_0] : memref<32x48xf32, #tpu.memory_space<vmem>>, vector<32x48xf32>
    %c0_1 = arith.constant 0 : index
    %c0_2 = arith.constant 0 : index
    %5 = vector.load %arg2[%c0_1, %c0_2] : memref<48x384xf32, #tpu.memory_space<vmem>>, vector<48x384xf32>
    %c0_3 = arith.constant 0 : index
    %c0_4 = arith.constant 0 : index
    %6 = vector.load %arg3[%c0_3, %c0_4] : memref<16x96xf32, #tpu.memory_space<vmem>>, vector<16x96xf32>
    %cst = arith.constant dense<0.000000e+00> : vector<32x384xf32>
    %7 = tpu.matmul %4, %5, %cst {dimension_numbers = #tpu.dot_dimension_numbers<[1], [0], [0], [1], [0, 0, 1, 1], [], []>} : vector<32x48xf32>, vector<48x384xf32>, vector<32x384xf32> -> vector<32x384xf32>
    %8 = vector.extract_strided_slice %7 {offsets = [0, 0], sizes = [32, 128], strides = [1, 1]} : vector<32x384xf32> to vector<32x128xf32>
    %9 = vector.extract_strided_slice %7 {offsets = [0, 128], sizes = [32, 128], strides = [1, 1]} : vector<32x384xf32> to vector<32x128xf32>
    %10 = vector.extract_strided_slice %7 {offsets = [0, 256], sizes = [32, 128], strides = [1, 1]} : vector<32x384xf32> to vector<32x128xf32>
    %11 = tpu.concatenate %8, %9, %10 in 0 : vector<32x128xf32>, vector<32x128xf32>, vector<32x128xf32> -> vector<96x128xf32>
    %cst_5 = arith.constant dense<0.000000e+00> : vector<16x128xf32>
    %12 = tpu.matmul %6, %11, %cst_5 {dimension_numbers = #tpu.dot_dimension_numbers<[1], [0], [0], [1], [0, 0, 1, 1], [], []>} : vector<16x96xf32>, vector<96x128xf32>, vector<16x128xf32> -> vector<16x128xf32>
    %cst_6 = arith.constant dense<0.000000e+00> : vector<128xf32>
    %13 = vector.multi_reduction <add>, %12, %cst_6 [0] : vector<16x128xf32> to vector<128xf32>
    %14 = vector.shape_cast %13 : vector<128xf32> to vector<1x128xf32>
    %c16_i32 = arith.constant 16 : i32
    %15 = tpu.dynamic_rotate %14 by %c16_i32 dim 1 : vector<1x128xf32>, i32 -> vector<1x128xf32>
    %16 = arith.addf %14, %15 : vector<1x128xf32>
    %c32_i32 = arith.constant 32 : i32
    %17 = tpu.dynamic_rotate %16 by %c32_i32 dim 1 : vector<1x128xf32>, i32 -> vector<1x128xf32>
    %18 = arith.addf %16, %17 : vector<1x128xf32>
    %c64_i32 = arith.constant 64 : i32
    %19 = tpu.dynamic_rotate %18 by %c64_i32 dim 1 : vector<1x128xf32>, i32 -> vector<1x128xf32>
    %20 = arith.addf %18, %19 : vector<1x128xf32>
    %cst_7 = arith.constant 7.812500e-03 : f32
    %21 = vector.broadcast %cst_7 : f32 to vector<1x128xf32>
    %22 = arith.mulf %20, %21 : vector<1x128xf32>
    %23 = arith.mulf %12, %12 : vector<16x128xf32>
    %cst_8 = arith.constant dense<0.000000e+00> : vector<128xf32>
    %24 = vector.multi_reduction <add>, %23, %cst_8 [0] : vector<16x128xf32> to vector<128xf32>
    %25 = vector.shape_cast %24 : vector<128xf32> to vector<1x128xf32>
    %c16_i32_9 = arith.constant 16 : i32
    %26 = tpu.dynamic_rotate %25 by %c16_i32_9 dim 1 : vector<1x128xf32>, i32 -> vector<1x128xf32>
    %27 = arith.addf %25, %26 : vector<1x128xf32>
    %c32_i32_10 = arith.constant 32 : i32
    %28 = tpu.dynamic_rotate %27 by %c32_i32_10 dim 1 : vector<1x128xf32>, i32 -> vector<1x128xf32>
    %29 = arith.addf %27, %28 : vector<1x128xf32>
    %c64_i32_11 = arith.constant 64 : i32
    %30 = tpu.dynamic_rotate %29 by %c64_i32_11 dim 1 : vector<1x128xf32>, i32 -> vector<1x128xf32>
    %31 = arith.addf %29, %30 : vector<1x128xf32>
    %cst_12 = arith.constant 7.812500e-03 : f32
    %32 = vector.broadcast %cst_12 : f32 to vector<1x128xf32>
    %33 = arith.mulf %31, %32 : vector<1x128xf32>
    %34 = arith.mulf %22, %22 : vector<1x128xf32>
    %35 = arith.subf %33, %34 : vector<1x128xf32>
    %c0_13 = arith.constant 0 : index
    %c0_14 = arith.constant 0 : index
    %36 = vector.load %arg8[%c0_13, %c0_14] : memref<3x128xf32, #tpu.memory_space<vmem>>, vector<1x128xf32>
    %cst_15 = arith.constant 9.99999974E-6 : f32
    %37 = vector.broadcast %cst_15 : f32 to vector<1x128xf32>
    %38 = arith.addf %35, %37 : vector<1x128xf32>
    %39 = math.rsqrt %38 : vector<1x128xf32>
    %40 = arith.mulf %36, %39 : vector<1x128xf32>
    %c0_16 = arith.constant 0 : index
    %c0_17 = arith.constant 0 : index
    %41 = vector.load %arg9[%c0_16, %c0_17] : memref<3x128xf32, #tpu.memory_space<vmem>>, vector<1x128xf32>
    %42 = arith.mulf %22, %40 : vector<1x128xf32>
    %43 = arith.subf %41, %42 : vector<1x128xf32>
    %44 = vector.broadcast %40 : vector<1x128xf32> to vector<16x128xf32>
    %45 = arith.mulf %12, %44 : vector<16x128xf32>
    %46 = vector.broadcast %43 : vector<1x128xf32> to vector<16x128xf32>
    %47 = arith.addf %45, %46 : vector<16x128xf32>
    %cst_18 = arith.constant 0.000000e+00 : f32
    %48 = vector.broadcast %cst_18 : f32 to vector<16x128xf32>
    %49 = arith.maximumf %47, %48 : vector<16x128xf32>
    %c0_19 = arith.constant 0 : index
    %c0_20 = arith.constant 0 : index
    %50 = vector.load %arg4[%c0_19, %c0_20] : memref<128x384xf32, #tpu.memory_space<vmem>>, vector<128x384xf32>
    %c0_21 = arith.constant 0 : index
    %c0_22 = arith.constant 0 : index
    %51 = vector.load %arg5[%c0_21, %c0_22] : memref<8x48xf32, #tpu.memory_space<vmem>>, vector<8x48xf32>
    %cst_23 = arith.constant dense<0.000000e+00> : vector<16x384xf32>
    %52 = tpu.matmul %49, %50, %cst_23 {dimension_numbers = #tpu.dot_dimension_numbers<[1], [0], [0], [1], [0, 0, 1, 1], [], []>} : vector<16x128xf32>, vector<128x384xf32>, vector<16x384xf32> -> vector<16x384xf32>
    %53 = vector.extract_strided_slice %52 {offsets = [0, 0], sizes = [16, 128], strides = [1, 1]} : vector<16x384xf32> to vector<16x128xf32>
    %54 = vector.extract_strided_slice %52 {offsets = [0, 128], sizes = [16, 128], strides = [1, 1]} : vector<16x384xf32> to vector<16x128xf32>
    %55 = vector.extract_strided_slice %52 {offsets = [0, 256], sizes = [16, 128], strides = [1, 1]} : vector<16x384xf32> to vector<16x128xf32>
    %56 = tpu.concatenate %53, %54, %55 in 0 : vector<16x128xf32>, vector<16x128xf32>, vector<16x128xf32> -> vector<48x128xf32>
    %cst_24 = arith.constant dense<0.000000e+00> : vector<8x128xf32>
    %57 = tpu.matmul %51, %56, %cst_24 {dimension_numbers = #tpu.dot_dimension_numbers<[1], [0], [0], [1], [0, 0, 1, 1], [], []>} : vector<8x48xf32>, vector<48x128xf32>, vector<8x128xf32> -> vector<8x128xf32>
    %cst_25 = arith.constant dense<0.000000e+00> : vector<128xf32>
    %58 = vector.multi_reduction <add>, %57, %cst_25 [0] : vector<8x128xf32> to vector<128xf32>
    %59 = vector.shape_cast %58 : vector<128xf32> to vector<1x128xf32>
    %c32_i32_26 = arith.constant 32 : i32
    %60 = tpu.dynamic_rotate %59 by %c32_i32_26 dim 1 : vector<1x128xf32>, i32 -> vector<1x128xf32>
    %61 = arith.addf %59, %60 : vector<1x128xf32>
    %c64_i32_27 = arith.constant 64 : i32
    %62 = tpu.dynamic_rotate %61 by %c64_i32_27 dim 1 : vector<1x128xf32>, i32 -> vector<1x128xf32>
    %63 = arith.addf %61, %62 : vector<1x128xf32>
    %cst_28 = arith.constant 3.125000e-02 : f32
    %64 = vector.broadcast %cst_28 : f32 to vector<1x128xf32>
    %65 = arith.mulf %63, %64 : vector<1x128xf32>
    %66 = arith.mulf %57, %57 : vector<8x128xf32>
    %cst_29 = arith.constant dense<0.000000e+00> : vector<128xf32>
    %67 = vector.multi_reduction <add>, %66, %cst_29 [0] : vector<8x128xf32> to vector<128xf32>
    %68 = vector.shape_cast %67 : vector<128xf32> to vector<1x128xf32>
    %c32_i32_30 = arith.constant 32 : i32
    %69 = tpu.dynamic_rotate %68 by %c32_i32_30 dim 1 : vector<1x128xf32>, i32 -> vector<1x128xf32>
    %70 = arith.addf %68, %69 : vector<1x128xf32>
    %c64_i32_31 = arith.constant 64 : i32
    %71 = tpu.dynamic_rotate %70 by %c64_i32_31 dim 1 : vector<1x128xf32>, i32 -> vector<1x128xf32>
    %72 = arith.addf %70, %71 : vector<1x128xf32>
    %cst_32 = arith.constant 3.125000e-02 : f32
    %73 = vector.broadcast %cst_32 : f32 to vector<1x128xf32>
    %74 = arith.mulf %72, %73 : vector<1x128xf32>
    %75 = arith.mulf %65, %65 : vector<1x128xf32>
    %76 = arith.subf %74, %75 : vector<1x128xf32>
    %c1 = arith.constant 1 : index
    %c0_33 = arith.constant 0 : index
    %77 = vector.load %arg8[%c1, %c0_33] : memref<3x128xf32, #tpu.memory_space<vmem>>, vector<1x128xf32>
    %cst_34 = arith.constant 9.99999974E-6 : f32
    %78 = vector.broadcast %cst_34 : f32 to vector<1x128xf32>
    %79 = arith.addf %76, %78 : vector<1x128xf32>
    %80 = math.rsqrt %79 : vector<1x128xf32>
    %81 = arith.mulf %77, %80 : vector<1x128xf32>
    %c1_35 = arith.constant 1 : index
    %c0_36 = arith.constant 0 : index
    %82 = vector.load %arg9[%c1_35, %c0_36] : memref<3x128xf32, #tpu.memory_space<vmem>>, vector<1x128xf32>
    %83 = arith.mulf %65, %81 : vector<1x128xf32>
    %84 = arith.subf %82, %83 : vector<1x128xf32>
    %85 = vector.broadcast %81 : vector<1x128xf32> to vector<8x128xf32>
    %86 = arith.mulf %57, %85 : vector<8x128xf32>
    %87 = vector.broadcast %84 : vector<1x128xf32> to vector<8x128xf32>
    %88 = arith.addf %86, %87 : vector<8x128xf32>
    %cst_37 = arith.constant 0.000000e+00 : f32
    %89 = vector.broadcast %cst_37 : f32 to vector<8x128xf32>
    %90 = arith.maximumf %88, %89 : vector<8x128xf32>
    %c0_i32_38 = arith.constant 0 : i32
    %91 = tpu.memref_slice %arg16[%c0_i32_38] : memref<2x!tpu.dma_semaphore, #tpu.memory_space<semaphore_mem>> -> memref<1x!tpu.dma_semaphore, #tpu.memory_space<semaphore_mem>>
    %92 = tpu.memref_squeeze %91 : memref<1x!tpu.dma_semaphore, #tpu.memory_space<semaphore_mem>> -> memref<!tpu.dma_semaphore, #tpu.memory_space<semaphore_mem>>
    tpu.wait_dma2 semaphore(%92 : memref<!tpu.dma_semaphore, #tpu.memory_space<semaphore_mem>>) src(%arg6 : memref<128x384xf32, #tpu.memory_space<any>>) dst(%arg14 : memref<128x384xf32, #tpu.memory_space<vmem>>)
    %c0_39 = arith.constant 0 : index
    %c0_40 = arith.constant 0 : index
    %93 = vector.load %arg14[%c0_39, %c0_40] : memref<128x384xf32, #tpu.memory_space<vmem>>, vector<128x384xf32>
    %c0_41 = arith.constant 0 : index
    %c0_42 = arith.constant 0 : index
    %94 = vector.load %arg7[%c0_41, %c0_42] : memref<4x24xf32, #tpu.memory_space<vmem>>, vector<4x24xf32>
    %cst_43 = arith.constant dense<0.000000e+00> : vector<8x384xf32>
    %95 = tpu.matmul %90, %93, %cst_43 {dimension_numbers = #tpu.dot_dimension_numbers<[1], [0], [0], [1], [0, 0, 1, 1], [], []>} : vector<8x128xf32>, vector<128x384xf32>, vector<8x384xf32> -> vector<8x384xf32>
    %96 = vector.extract_strided_slice %95 {offsets = [0, 0], sizes = [8, 128], strides = [1, 1]} : vector<8x384xf32> to vector<8x128xf32>
    %97 = vector.extract_strided_slice %95 {offsets = [0, 128], sizes = [8, 128], strides = [1, 1]} : vector<8x384xf32> to vector<8x128xf32>
    %98 = vector.extract_strided_slice %95 {offsets = [0, 256], sizes = [8, 128], strides = [1, 1]} : vector<8x384xf32> to vector<8x128xf32>
    %99 = tpu.concatenate %96, %97, %98 in 0 : vector<8x128xf32>, vector<8x128xf32>, vector<8x128xf32> -> vector<24x128xf32>
    %cst_44 = arith.constant dense<0.000000e+00> : vector<4x128xf32>
    %100 = tpu.matmul %94, %99, %cst_44 {dimension_numbers = #tpu.dot_dimension_numbers<[1], [0], [0], [1], [0, 0, 1, 1], [], []>} : vector<4x24xf32>, vector<24x128xf32>, vector<4x128xf32> -> vector<4x128xf32>
    %cst_45 = arith.constant dense<0.000000e+00> : vector<128xf32>
    %101 = vector.multi_reduction <add>, %100, %cst_45 [0] : vector<4x128xf32> to vector<128xf32>
    %102 = vector.shape_cast %101 : vector<128xf32> to vector<1x128xf32>
    %c64_i32_46 = arith.constant 64 : i32
    %103 = tpu.dynamic_rotate %102 by %c64_i32_46 dim 1 : vector<1x128xf32>, i32 -> vector<1x128xf32>
    %104 = arith.addf %102, %103 : vector<1x128xf32>
    %cst_47 = arith.constant 1.250000e-01 : f32
    %105 = vector.broadcast %cst_47 : f32 to vector<1x128xf32>
    %106 = arith.mulf %104, %105 : vector<1x128xf32>
    %107 = arith.mulf %100, %100 : vector<4x128xf32>
    %cst_48 = arith.constant dense<0.000000e+00> : vector<128xf32>
    %108 = vector.multi_reduction <add>, %107, %cst_48 [0] : vector<4x128xf32> to vector<128xf32>
    %109 = vector.shape_cast %108 : vector<128xf32> to vector<1x128xf32>
    %c64_i32_49 = arith.constant 64 : i32
    %110 = tpu.dynamic_rotate %109 by %c64_i32_49 dim 1 : vector<1x128xf32>, i32 -> vector<1x128xf32>
    %111 = arith.addf %109, %110 : vector<1x128xf32>
    %cst_50 = arith.constant 1.250000e-01 : f32
    %112 = vector.broadcast %cst_50 : f32 to vector<1x128xf32>
    %113 = arith.mulf %111, %112 : vector<1x128xf32>
    %114 = arith.mulf %106, %106 : vector<1x128xf32>
    %115 = arith.subf %113, %114 : vector<1x128xf32>
    %c2 = arith.constant 2 : index
    %c0_51 = arith.constant 0 : index
    %116 = vector.load %arg8[%c2, %c0_51] : memref<3x128xf32, #tpu.memory_space<vmem>>, vector<1x128xf32>
    %cst_52 = arith.constant 9.99999974E-6 : f32
    %117 = vector.broadcast %cst_52 : f32 to vector<1x128xf32>
    %118 = arith.addf %115, %117 : vector<1x128xf32>
    %119 = math.rsqrt %118 : vector<1x128xf32>
    %120 = arith.mulf %116, %119 : vector<1x128xf32>
    %c2_53 = arith.constant 2 : index
    %c0_54 = arith.constant 0 : index
    %121 = vector.load %arg9[%c2_53, %c0_54] : memref<3x128xf32, #tpu.memory_space<vmem>>, vector<1x128xf32>
    %122 = arith.mulf %106, %120 : vector<1x128xf32>
    %123 = arith.subf %121, %122 : vector<1x128xf32>
    %124 = vector.broadcast %120 : vector<1x128xf32> to vector<4x128xf32>
    %125 = arith.mulf %100, %124 : vector<4x128xf32>
    %126 = vector.broadcast %123 : vector<1x128xf32> to vector<4x128xf32>
    %127 = arith.addf %125, %126 : vector<4x128xf32>
    %cst_55 = arith.constant 0.000000e+00 : f32
    %128 = vector.broadcast %cst_55 : f32 to vector<4x128xf32>
    %129 = arith.maximumf %127, %128 : vector<4x128xf32>
    %c0_56 = arith.constant 0 : index
    %c0_57 = arith.constant 0 : index
    %130 = vector.load %arg10[%c0_56, %c0_57] : memref<2x4xf32, #tpu.memory_space<vmem>>, vector<2x4xf32>
    %cst_58 = arith.constant dense<0.000000e+00> : vector<2x128xf32>
    %131 = tpu.matmul %130, %129, %cst_58 {dimension_numbers = #tpu.dot_dimension_numbers<[1], [0], [0], [1], [0, 0, 1, 1], [], []>} : vector<2x4xf32>, vector<4x128xf32>, vector<2x128xf32> -> vector<2x128xf32>
    %132 = vector.extract_strided_slice %131 {offsets = [0, 0], sizes = [2, 64], strides = [1, 1]} : vector<2x128xf32> to vector<2x64xf32>
    %133 = vector.extract_strided_slice %131 {offsets = [0, 64], sizes = [2, 64], strides = [1, 1]} : vector<2x128xf32> to vector<2x64xf32>
    %134 = arith.addf %132, %133 : vector<2x64xf32>
    %c1_i32_59 = arith.constant 1 : i32
    %135 = tpu.memref_slice %arg16[%c1_i32_59] : memref<2x!tpu.dma_semaphore, #tpu.memory_space<semaphore_mem>> -> memref<1x!tpu.dma_semaphore, #tpu.memory_space<semaphore_mem>>
    %136 = tpu.memref_squeeze %135 : memref<1x!tpu.dma_semaphore, #tpu.memory_space<semaphore_mem>> -> memref<!tpu.dma_semaphore, #tpu.memory_space<semaphore_mem>>
    tpu.wait_dma2 semaphore(%136 : memref<!tpu.dma_semaphore, #tpu.memory_space<semaphore_mem>>) src(%arg11 : memref<64x512xf32, #tpu.memory_space<any>>) dst(%arg15 : memref<64x512xf32, #tpu.memory_space<vmem>>)
    %c0_60 = arith.constant 0 : index
    %c0_61 = arith.constant 0 : index
    %137 = vector.load %arg15[%c0_60, %c0_61] : memref<64x512xf32, #tpu.memory_space<vmem>>, vector<64x512xf32>
    %cst_62 = arith.constant dense<0.000000e+00> : vector<2x512xf32>
    %138 = tpu.matmul %134, %137, %cst_62 {dimension_numbers = #tpu.dot_dimension_numbers<[1], [0], [0], [1], [0, 0, 1, 1], [], []>} : vector<2x64xf32>, vector<64x512xf32>, vector<2x512xf32> -> vector<2x512xf32>
    %c0_63 = arith.constant 0 : index
    %c0_64 = arith.constant 0 : index
    %139 = vector.load %arg12[%c0_63, %c0_64] : memref<1x512xf32, #tpu.memory_space<vmem>>, vector<1x512xf32>
    %140 = vector.broadcast %139 : vector<1x512xf32> to vector<2x512xf32>
    %141 = arith.addf %138, %140 : vector<2x512xf32>
    %c0_65 = arith.constant 0 : index
    %c0_66 = arith.constant 0 : index
    %142 = vector.load %arg13[%c0_65, %c0_66] : memref<2x512xf32, #tpu.memory_space<vmem>>, vector<2x512xf32>
    tpu.vector_store %arg13[%c0_65, %c0_66], %141 {strides = array<i32>} : memref<2x512xf32, #tpu.memory_space<vmem>>, vector<2x512xf32>,
    return
  }
  func.func @transform_0(%arg0: i32) -> (i32, i32) {
    %c0_i32 = arith.constant 0 : i32
    %c0_i32_0 = arith.constant 0 : i32
    %c0_i32_1 = arith.constant 0 : i32
    return %c0_i32, %c0_i32_0 : i32, i32
  }
  func.func @transform_1(%arg0: i32) -> (i32, i32) {
    %c0_i32 = arith.constant 0 : i32
    %c0_i32_0 = arith.constant 0 : i32
    %c0_i32_1 = arith.constant 0 : i32
    return %c0_i32, %c0_i32_0 : i32, i32
  }
  func.func @transform_2(%arg0: i32) -> (i32, i32) {
    %c0_i32 = arith.constant 0 : i32
    %c0_i32_0 = arith.constant 0 : i32
    %c0_i32_1 = arith.constant 0 : i32
    return %c0_i32, %c0_i32_0 : i32, i32
  }
  func.func @transform_3(%arg0: i32) -> (i32, i32) {
    %c0_i32 = arith.constant 0 : i32
    %c0_i32_0 = arith.constant 0 : i32
    %c0_i32_1 = arith.constant 0 : i32
    return %c0_i32, %c0_i32_0 : i32, i32
  }
  func.func @transform_4(%arg0: i32) -> (i32, i32) {
    %c0_i32 = arith.constant 0 : i32
    %c0_i32_0 = arith.constant 0 : i32
    %c0_i32_1 = arith.constant 0 : i32
    return %c0_i32, %c0_i32_0 : i32, i32
  }
  func.func @transform_6(%arg0: i32) -> (i32, i32) {
    %c0_i32 = arith.constant 0 : i32
    %c0_i32_0 = arith.constant 0 : i32
    %c0_i32_1 = arith.constant 0 : i32
    return %c0_i32, %c0_i32_0 : i32, i32
  }
  func.func @transform_7(%arg0: i32) -> (i32, i32) {
    %c0_i32 = arith.constant 0 : i32
    %c0_i32_0 = arith.constant 0 : i32
    %c0_i32_1 = arith.constant 0 : i32
    return %c0_i32, %c0_i32_0 : i32, i32
  }
  func.func @transform_8(%arg0: i32) -> (i32, i32) {
    %c0_i32 = arith.constant 0 : i32
    %c0_i32_0 = arith.constant 0 : i32
    %c0_i32_1 = arith.constant 0 : i32
    return %c0_i32, %c0_i32_0 : i32, i32
  }
  func.func @transform_9(%arg0: i32) -> (i32, i32) {
    %c0_i32 = arith.constant 0 : i32
    %c0_i32_0 = arith.constant 0 : i32
    %c0_i32_1 = arith.constant 0 : i32
    return %c0_i32, %c0_i32_0 : i32, i32
  }
  func.func @transform_11(%arg0: i32) -> (i32, i32) {
    %c0_i32 = arith.constant 0 : i32
    %c0_i32_0 = arith.constant 0 : i32
    %c0_i32_1 = arith.constant 0 : i32
    return %c0_i32, %c0_i32_0 : i32, i32
  }
  func.func @transform_12(%arg0: i32) -> (i32, i32) {
    %c0_i32 = arith.constant 0 : i32
    %c0_i32_0 = arith.constant 0 : i32
    %c0_i32_1 = arith.constant 0 : i32
    return %c0_i32, %c0_i32_0 : i32, i32
  }
}

</mosaic_0001>

<bundles_post_ra>
// kernel: simple_cnn_forward.1
= control target key start
LH: loop header
LB: loop body
LE: loop exit
PB: predicated region body
PF: predicated region fallthrough
CT: control target
= control target key end

     0   :  { %17 = vsyncpa [#allocation6], 0  ;;  %s2171_s0 = inlined_call_operand.vmem [shape: f32[32,48], index: 0, kind: input, shape index: {}]   ;;  %s2172_s1 = inlined_call_operand.hbm [shape: f32[48,384], index: 1, kind: input, shape index: {}]   ;;  %s2173_s2 = inlined_call_operand.vmem [shape: f32[16,96], index: 2, kind: input, shape index: {}]   ;;  %s2174_s3 = inlined_call_operand.vmem [shape: f32[128,384], index: 3, kind: input, shape index: {}]   ;;  %s2175_s4 = inlined_call_operand.vmem [shape: f32[8,48], index: 4, kind: input, shape index: {}]   ;;  %s2176_s5 = inlined_call_operand.hbm [shape: f32[128,384], index: 5, kind: input, shape index: {}]   ;;  %s2177_s6 = inlined_call_operand.vmem [shape: f32[4,24], index: 6, kind: input, shape index: {}]   ;;  %s2178_s7 = inlined_call_operand.vmem [shape: f32[3,128], index: 7, kind: input, shape index: {}]   ;;  %s2179_s8 = inlined_call_operand.vmem [shape: f32[3,128], index: 8, kind: input, shape index: {}]   ;;  %s2180_s9 = inlined_call_operand.vmem [shape: f32[2,4], index: 9, kind: input, shape index: {}]   ;;  %s2181_s10 = inlined_call_operand.hbm [shape: f32[64,512], index: 10, kind: input, shape index: {}]   ;;  %s2182_s11 = inlined_call_operand.hbm [shape: f32[1,512], index: 11, kind: input, shape index: {}]   ;;  %s2183_s12 = inlined_call_operand.hbm [shape: f32[2,512], index: 12, kind: output, shape index: {}]  }
   0x1   :  { %18 = vsyncpa [#allocation9], 0 }
   0x2   :  { %19 = vsyncpa [#allocation7], 0  ;;  %s1774_s21 = smov [#allocation5]  }
   0x3   :  { %s27_s22 = sshll.u32 %s1774_s21, 4  ;;  %s28_s22 = int_to_ptr.vmem [resolvable:$true] %s27_s22 }
   0x4   :  { %s1672_s23 = scalar_lea.vmem %s28_s22, 2304  ;;  %p1677_p1 = scmp.lt.s32.totalorder %s28_s22, %s28_s22 }
   0x5   :  { %p1673_p0 = scmp.ne.s32.totalorder %s28_s22, %s1672_s23  ;;  %p1678_p2 = scmp.lt.s32.totalorder %s1672_s23, %s1672_s23 }
   0x7   :  { %p1679_p3 = por %p1678_p2, %p1677_p1 }
   0x9   :  { %p1680_p4 = pnand %p1679_p3, %p1673_p0 }
   0xb   :  { %1683 = shalt.err (!%p1680_p4)
}
   0xc   :  { %s1775_s24 = smov 384   ;;  %s1776_s25 = smov 24  }
   0xd   :  { %33 = dma.hbm_to_vmem [thread:$0]  %s2172_s1, 2304, %s28_s22, [#allocation6], %s1775_s24, %s1775_s24, %s1776_s25  }
   0xe   :  { %s1777_s28 = smov [#allocation8]  }
   0xf   :  { %s54_s29 = sshll.u32 %s1777_s28, 4  ;;  %s55_s29 = int_to_ptr.vmem [resolvable:$true] %s54_s29 }
  0x10   :  { %s1692_s30 = scalar_lea.vmem %s55_s29, 64  ;;  %p1697_p6 = scmp.lt.s32.totalorder %s55_s29, %s55_s29 }
  0x11   :  { %p1693_p5 = scmp.ne.s32.totalorder %s55_s29, %s1692_s30  ;;  %p1698_p7 = scmp.lt.s32.totalorder %s1692_s30, %s1692_s30 }
  0x13   :  { %p1699_p8 = por %p1698_p7, %p1697_p6 }
  0x15   :  { %p1700_p9 = pnand %p1699_p8, %p1693_p5 }
  0x17   :  { %1703 = shalt.err (!%p1700_p9)
}
  0x18   :  { %57 = dma.hbm_to_vmem [thread:$0]  %s2182_s11, 64, %s55_s29, [#allocation9]  }
  0x19   :  { %1764 = dma.done.wait [#allocation6], 2304  }
  0x1a   :  { %1765 = vsyncadd [#allocation6], 4294964992 }
  0x1b   :  { %1766 = dma.done.wait [#allocation9], 64  }
  0x1c   :  { %1767 = vsyncadd [#allocation9], 4294967232  ;;  %v1778_v0 = vmov 0.0   ;;  %v107_v1 = vld [vmem:[#allocation5 + $0x80] sm:$0xff]  ;;  %v108_v2 = vld [vmem:[#allocation5 + $0x88] sm:$0xff]  ;;  %vm111_vm0 = vcmask 392192  }
  0x1d   :  { %188 = vmatprep.mubr.f32.mxu0 %v1778_v0  ;;  %v106_v3 = vld [vmem:[#allocation5 + $0x78] sm:$0xff]  ;;  %144 = vmatprep.subr.mxu0 %v107_v1  ;;  %v104_v4 = vld [vmem:[#allocation5 + $0x68] sm:$0xff]  ;;  %v105_v5 = vld [vmem:[#allocation5 + $0x70] sm:$0xff]  ;;  %vm298_vm1 = vcmask 785408   ;;  %s1780_s24 = smov 32   ;;  %vm1782_vm2 = vmmov 0  }
  0x1e   :  { %1501 = vmatprep.subr.mxu1 %v108_v2  ;;  %v103_v6 = vld [vmem:[#allocation5 + $0x60] sm:$0xff]  ;;  %145 = vmatpush1.msra.mxu0 %v106_v3  ;;  %v101_v7 = vld [vmem:[#allocation5 + $0x50] sm:$0xff]  ;;  %v102_v8 = vld [vmem:[#allocation5 + $0x58] sm:$0xff]  ;;  %s1784_s27 = smov [#allocation3]  }
  0x1f   :  { %1502 = vmatpush3.msra.mxu1 %v108_v2  ;;  %146 = vmatprep.subr.mxu0 %v104_v4  ;;  %v100_v9 = vld [vmem:[#allocation5 + $0x48] sm:$0xff]  ;;  %v98_v10 = vld [vmem:[#allocation5 + $0x38] sm:$0xff]  ;;  %v99_v11 = vld [vmem:[#allocation5 + $0x40] sm:$0xff]  ;;  %s83_s28 = sshll.u32 %s1784_s27, 4  ;;  %s84_s28 = int_to_ptr.vmem [resolvable:$true] %s83_s28 }
  0x20   :  { %1503 = vmatprep.subr.mxu1 %v105_v5  ;;  %147 = vmatpush1.msra.mxu0 %v103_v6  ;;  %v97_v12 = vld [vmem:[#allocation5 + $0x30] sm:$0xff]  ;;  %v95_v13 = vld [vmem:[#allocation5 + $0x20] sm:$0xff]  ;;  %v96_v14 = vld [vmem:[#allocation5 + $0x28] sm:$0xff] }
  0x21   :  { %1504 = vmatpush3.msra.mxu1 %v105_v5  ;;  %148 = vmatprep.subr.mxu0 %v101_v7  ;;  %v94_v15 = vld [vmem:[#allocation5 + $0x18] sm:$0xff]  ;;  %v92_v16 = vld [vmem:[#allocation5 + $0x8] sm:$0xff]  ;;  %v93_v17 = vld [vmem:[#allocation5 + $0x10] sm:$0xff] }
  0x22   :  { %1505 = vmatprep.subr.mxu1 %v102_v8  ;;  %149 = vmatpush1.msra.mxu0 %v100_v9  ;;  %v91_v18 = vld [vmem:[#allocation5] sm:$0xff]  ;;  %v88_v20 = vld [vmem:[%s2171_s0 + $0x8] sm:$0xff]  ;;  %v89_v21 = vld [vmem:[%s2171_s0 + $0x10] sm:$0xff] }
  0x23   :  { %1506 = vmatpush3.msra.mxu1 %v102_v8  ;;  %150 = vmatprep.subr.mxu0 %v98_v10  ;;  %v87_v19 = vld [vmem:[%s2171_s0] sm:$0xff]  ;;  %v90_v22 = vld [vmem:[%s2171_s0 + $0x18] sm:$0xff]  ;;  %v110_v36 = vld [vmem:[%s2173_s2 + $0x8] sm:$0xff] }
  0x24   :  { %1507 = vmatprep.subr.mxu1 %v99_v11  ;;  %151 = vmatpush1.msra.mxu0 %v97_v12  ;;  %v109_v23 = vld [vmem:[%s2173_s2] sm:$0xff]  ;;  %s1779_s2 = smov 16   ;;  %v485_v59 = vld [vmem:[%s2174_s3 + $0x170] sm:$0xff]  ;;  %v484_v60 = vld [vmem:[%s2174_s3 + $0x168] sm:$0xff] }
  0x25   :  { %1508 = vmatpush3.msra.mxu1 %v99_v11  ;;  %152 = vmatprep.subr.mxu0 %v95_v13  ;;  %v486_v61 = vld [vmem:[%s2174_s3 + $0x178] sm:$0xff]  ;;  %v481_v63 = vld [vmem:[%s2174_s3 + $0x150] sm:$0xff]  ;;  %v483_v1 = vld [vmem:[%s2174_s3 + $0x160] sm:$0xff] }
  0x26   :  { %1509 = vmatprep.subr.mxu1 %v96_v14  ;;  %153 = vmatpush1.msra.mxu0 %v94_v15  ;;  %v482_v62 = vld [vmem:[%s2174_s3 + $0x158] sm:$0xff]  ;;  %v479_v3 = vld [vmem:[%s2174_s3 + $0x140] sm:$0xff]  ;;  %v480_v6 = vld [vmem:[%s2174_s3 + $0x148] sm:$0xff] }
  0x27   :  { %1510 = vmatpush3.msra.mxu1 %v96_v14  ;;  %154 = vmatprep.subr.mxu0 %v92_v16  ;;  %v478_v5 = vld [vmem:[%s2174_s3 + $0x138] sm:$0xff]  ;;  %v476_v7 = vld [vmem:[%s2174_s3 + $0x128] sm:$0xff]  ;;  %v475_v8 = vld [vmem:[%s2174_s3 + $0x120] sm:$0xff] }
  0x28   :  { %1511 = vmatprep.subr.mxu1 %v93_v17  ;;  %155 = vmatpush1.msra.mxu0 %v91_v18  ;;  %v477_v9 = vld [vmem:[%s2174_s3 + $0x130] sm:$0xff]  ;;  %v472_v13 = vld [vmem:[%s2174_s3 + $0x108] sm:$0xff]  ;;  %v474_v14 = vld [vmem:[%s2174_s3 + $0x118] sm:$0xff] }
  0x29   :  { %1512 = vmatpush3.msra.mxu1 %v93_v17  ;;  %1513 = vmatprep.mubr.msk.f32.mxu1 %vm111_vm0, %v87_v19  ;;  %v473_v11 = vld [vmem:[%s2174_s3 + $0x110] sm:$0xff]  ;;  %v470_v15 = vld [vmem:[%s2174_s3 + $0xf8] sm:$0xff]  ;;  %v471_v17 = vld [vmem:[%s2174_s3 + $0x100] sm:$0xff] }
  0x2a   :  { %1411 = vmatmul.mubr.msk.f32.vlgmr.msra.gmra.mxu0 %vm111_vm0, %v87_v19  ;;  %1514 = vmatmul.mubr.msk.f32.vlgmr.msra.gmra.mxu1 %vm111_vm0, %v88_v20  ;;  %v469_v16 = vld [vmem:[%s2174_s3 + $0xf0] sm:$0xff]  ;;  %v467_v18 = vld [vmem:[%s2174_s3 + $0xe0] sm:$0xff]  ;;  %v466_v19 = vld [vmem:[%s2174_s3 + $0xd8] sm:$0xff] }
  0x2b   :  { %194 = vmatprep.mubr.f32.mxu0 %v1778_v0  ;;  %1516 = vmatprep.mubr.msk.f32.mxu1 %vm111_vm0, %v89_v21 }
  0x2c   :  { %488 = vmatprep.subr.mxu1 %v485_v59  ;;  %v425_v59 = vlaneseq }
  0x2d   :  { %489 = vmatpush1.msra.mxu1 %v484_v60 }
  0x2e   :  { %1412 = vmatmul.mubr.msk.f32.gmra.mxu0 %vm111_vm0, %v88_v20  ;;  %1517 = vmatmul.mubr.msk.f32.gmra.mxu1 %vm111_vm0, %v90_v22  ;;  %v468_v20 = vld [vmem:[%s2174_s3 + $0xe8] sm:$0xff]  ;;  %v2058_v60 = vshrl.u32 %v425_v59, 7 }
  0x2f   :  { %200 = vmatprep.mubr.f32.mxu0 %v1778_v0  ;;  %552 = vmatprep.mubr.f32.mxu1 %v1778_v0 }
  0x30   :  { %490 = vmatprep.subr.mxu1 %v482_v62  ;;  %v2064_v62 = vsub.s32 0, %v2058_v60 }
  0x31   :  { %491 = vmatpush1.msra.mxu1 %v481_v63 }
  0x32   :  { %1413 = vmatmul.mubr.msk.f32.gmra.mxu0 %vm111_vm0, %v89_v21  ;;  %492 = vmatprep.subr.mxu1 %v479_v3  ;;  %v464_v21 = vld [vmem:[%s2174_s3 + $0xc8] sm:$0xff] }
  0x33   :  { %206 = vmatprep.mubr.f32.mxu0 %v1778_v0  ;;  %493 = vmatpush1.msra.mxu1 %v478_v5 }
  0x34   :  { %494 = vmatprep.subr.mxu1 %v476_v7 }
  0x35   :  { %495 = vmatpush1.msra.mxu1 %v475_v8 }
  0x36   :  { %1414 = vmatmul.mubr.msk.f32.gmra.mxu0 %vm111_vm0, %v90_v22  ;;  %496 = vmatprep.subr.mxu1 %v473_v11  ;;  %v463_v22 = vld [vmem:[%s2174_s3 + $0xc0] sm:$0xff] }
  0x37   :  { %1543 = vmatprep.mubr.msk.f32.mxu0 %vm298_vm1, %v109_v23  ;;  %497 = vmatpush1.msra.mxu1 %v472_v13  ;;  %v465_v23 = vld [vmem:[%s2174_s3 + $0xd0] sm:$0xff] }
  0x38   :  { %498 = vmatprep.subr.mxu1 %v470_v15 }
  0x39   :  { %499 = vmatpush1.msra.mxu1 %v469_v16 }
  0x3a   :  { %500 = vmatprep.subr.mxu1 %v467_v18 }
  0x3b   :  { %501 = vmatpush1.msra.mxu1 %v466_v19 }
  0x3c   :  { %502 = vmatprep.subr.mxu1 %v464_v21 }
  0x3d   :  { %503 = vmatpush1.msra.mxu1 %v463_v22 }
  0xea   :  { %v190_v24 = vpop.f32.mrf.mxu0  ;;  %v1515_v25 = vpop.f32.mrf.mxu1 }
  0xec   :  { %v192_v26 = vpop.f32.mrf.mxu0  ;;  %v279_v27 = vpop.f32.mrf.mxu1 }
  0xee   :  { %v196_v28 = vpop.f32.mrf.mxu0  ;;  %v1518_v29 = vpop.f32.mrf.mxu1 }
  0xef   :  { %1519 = vmatprep.subr.mxu0 %v1518_v29 }
  0xf0   :  { %v198_v30 = vpop.f32.mrf.mxu0  ;;  %v289_v31 = vpop.f32.mrf.mxu1  ;;  %1520 = vmatpush3.msra.mxu0 %v1518_v29  ;;  %v459_v29 = vld [vmem:[%s2174_s3 + $0xa0] sm:$0xff] }
  0xf1   :  { %1521 = vmatprep.subr.mxu0 %v289_v31 }
  0xf2   :  { %v202_v32 = vpop.f32.mrf.mxu0  ;;  %1522 = vmatpush3.msra.mxu0 %v289_v31  ;;  %v454_v31 = vld [vmem:[%s2174_s3 + $0x78] sm:$0xff] }
  0xf3   :  { %1523 = vmatprep.subr.mxu0 %v1515_v25 }
  0xf4   :  { %v204_v33 = vpop.f32.mrf.mxu0  ;;  %1524 = vmatpush3.msra.mxu0 %v1515_v25  ;;  %v460_v25 = vld [vmem:[%s2174_s3 + $0xa8] sm:$0xff] }
  0xf5   :  { %1525 = vmatprep.subr.mxu0 %v279_v27 }
  0xf6   :  { %v208_v34 = vpop.f32.mrf.mxu0  ;;  %1526 = vmatpush3.msra.mxu0 %v279_v27  ;;  %v458_v27 = vld [vmem:[%s2174_s3 + $0x98] sm:$0xff] }
  0xf8   :  { %v210_v35 = vpop.f32.mrf.mxu0 }
  0xf9   :  { %1527 = vmatprep.subr.mxu0 %v210_v35 }
  0xfa   :  { %1528 = vmatpush3.msra.mxu0 %v210_v35  ;;  %v453_v35 = vld [vmem:[%s2174_s3 + $0x70] sm:$0xff] }
  0xfb   :  { %1529 = vmatprep.subr.mxu0 %v204_v33 }
  0xfc   :  { %1530 = vmatpush3.msra.mxu0 %v204_v33  ;;  %v452_v33 = vld [vmem:[%s2174_s3 + $0x68] sm:$0xff] }
  0xfd   :  { %1531 = vmatprep.subr.mxu0 %v198_v30 }
  0xfe   :  { %1532 = vmatpush3.msra.mxu0 %v198_v30  ;;  %v455_v30 = vld [vmem:[%s2174_s3 + $0x80] sm:$0xff] }
  0xff   :  { %1533 = vmatprep.subr.mxu0 %v192_v26 }
 0x100   :  { %1534 = vmatpush3.msra.mxu0 %v192_v26  ;;  %v462_v26 = vld [vmem:[%s2174_s3 + $0xb8] sm:$0xff] }
 0x101   :  { %1535 = vmatprep.subr.mxu0 %v208_v34 }
 0x102   :  { %1536 = vmatpush3.msra.mxu0 %v208_v34  ;;  %v451_v34 = vld [vmem:[%s2174_s3 + $0x60] sm:$0xff] }
 0x103   :  { %1537 = vmatprep.subr.mxu0 %v202_v32 }
 0x104   :  { %1538 = vmatpush3.msra.mxu0 %v202_v32  ;;  %v456_v32 = vld [vmem:[%s2174_s3 + $0x88] sm:$0xff] }
 0x105   :  { %1539 = vmatprep.subr.mxu0 %v196_v28 }
 0x106   :  { %1540 = vmatpush3.msra.mxu0 %v196_v28  ;;  %v457_v28 = vld [vmem:[%s2174_s3 + $0x90] sm:$0xff] }
 0x107   :  { %1541 = vmatprep.subr.mxu0 %v190_v24 }
 0x108   :  { %1542 = vmatpush3.msra.mxu0 %v190_v24  ;;  %v461_v24 = vld [vmem:[%s2174_s3 + $0xb0] sm:$0xff] }
 0x109   :  { %1544 = vmatmul.mubr.msk.f32.vlgmr.msra.gmra.mxu0 %vm298_vm1, %v110_v36  ;;  %1546 = vmatprep.subr.mxu0 %v486_v61  ;;  %v449_v36 = vld [vmem:[%s2174_s3 + $0x50] sm:$0xff] }
 0x10a   :  { %1547 = vmatpush3.msra.mxu0 %v486_v61  ;;  %504 = vmatprep.subr.mxu1 %v461_v24  ;;  %v418_v61 = vld [vmem:[%s2178_s7] sm:$0x1] }
 0x10b   :  { %1548 = vmatprep.subr.mxu0 %v483_v1  ;;  %505 = vmatpush1.msra.mxu1 %v460_v25 }
 0x10c   :  { %1549 = vmatpush3.msra.mxu0 %v483_v1  ;;  %506 = vmatprep.subr.mxu1 %v458_v27 }
 0x10d   :  { %1550 = vmatprep.subr.mxu0 %v480_v6  ;;  %507 = vmatpush1.msra.mxu1 %v457_v28 }
 0x10e   :  { %1551 = vmatpush3.msra.mxu0 %v480_v6  ;;  %508 = vmatprep.subr.mxu1 %v455_v30 }
 0x10f   :  { %1552 = vmatprep.subr.mxu0 %v477_v9  ;;  %509 = vmatpush1.msra.mxu1 %v454_v31 }
 0x110   :  { %1553 = vmatpush3.msra.mxu0 %v477_v9  ;;  %510 = vmatprep.subr.mxu1 %v452_v33 }
 0x111   :  { %1554 = vmatprep.subr.mxu0 %v474_v14  ;;  %511 = vmatpush1.msra.mxu1 %v451_v34 }
 0x112   :  { %1555 = vmatpush3.msra.mxu0 %v474_v14  ;;  %512 = vmatprep.subr.mxu1 %v449_v36 }
 0x113   :  { %1556 = vmatprep.subr.mxu0 %v471_v17 }
 0x114   :  { %1557 = vmatpush3.msra.mxu0 %v471_v17  ;;  %v487_v17 = vld [vmem:[%s2175_s4] sm:$0xff]  ;;  %s1783_s4 = smov [#allocation2]  }
 0x115   :  { %1558 = vmatprep.subr.mxu0 %v468_v20  ;;  %s71_s26 = sshll.u32 %s1783_s4, 4  ;;  %s72_s26 = int_to_ptr.vmem [resolvable:$true] %s71_s26 }
 0x116   :  { %1559 = vmatpush3.msra.mxu0 %v468_v20  ;;  %s1712_s29 = scalar_lea.vmem %s72_s26, 6144  ;;  %p1717_p11 = scmp.lt.s32.totalorder %s72_s26, %s72_s26 }
 0x117   :  { %1560 = vmatprep.subr.mxu0 %v465_v23  ;;  %p1713_p10 = scmp.ne.s32.totalorder %s72_s26, %s1712_s29  ;;  %p1718_p12 = scmp.lt.s32.totalorder %s1712_s29, %s1712_s29 }
 0x118   :  { %1561 = vmatpush3.msra.mxu0 %v465_v23 }
 0x119   :  { %1562 = vmatprep.subr.mxu0 %v462_v26  ;;  %p1719_p13 = por %p1718_p12, %p1717_p11 }
 0x11a   :  { %1563 = vmatpush3.msra.mxu0 %v462_v26 }
 0x11b   :  { %1564 = vmatprep.subr.mxu0 %v459_v29  ;;  %p1720_p0 = pnand %p1719_p13, %p1713_p10 }
 0x11c   :  { %1565 = vmatpush3.msra.mxu0 %v459_v29 }
 0x11d   :  { %1566 = vmatprep.subr.mxu0 %v456_v32 }
 0x11e   :  { %1567 = vmatpush3.msra.mxu0 %v456_v32 }
 0x11f   :  { %1568 = vmatprep.subr.mxu0 %v453_v35 }
 0x120   :  { %1569 = vmatpush3.msra.mxu0 %v453_v35 }
 0x1c9   :  { %v1891_v37 = vpop.f32.mrf.mxu0 }
 0x1ca   :  { %v398_v39 = vmul.f32 %v1891_v37, %v1891_v37 }
 0x1cb   :  { %v1893_v38 = vpop.f32.mrf.mxu0 }
 0x1cc   :  { %v380_v40 = vadd.f32 %v1891_v37, %v1893_v38  ;;  %v397_v41 = vmul.f32 %v1893_v38, %v1893_v38 }
 0x1ce   :  { %v381_v42 = vrot.slane %v380_v40, 4  ;;  %v399_v43 = vadd.f32 %v398_v39, %v397_v41  ;;  %v448_v39 = vld [vmem:[%s2174_s3 + $0x48] sm:$0xff]  ;;  %v446_v41 = vld [vmem:[%s2174_s3 + $0x38] sm:$0xff] }
 0x1cf   :  { %513 = vmatpush1.msra.mxu1 %v448_v39 }
 0x1d0   :  { %v400_v44 = vrot.slane %v399_v43, 4  ;;  %v382_v45 = vadd.f32 %v381_v42, %v380_v40  ;;  %v450_v40 = vld [vmem:[%s2174_s3 + $0x58] sm:$0xff]  ;;  %v445_v42 = vld [vmem:[%s2174_s3 + $0x30] sm:$0xff]  ;;  %514 = vmatprep.subr.mxu1 %v446_v41 }
 0x1d1   :  { %1570 = vmatprep.subr.mxu0 %v450_v40  ;;  %515 = vmatpush1.msra.mxu1 %v445_v42 }
 0x1d2   :  { %v401_v46 = vadd.f32 %v400_v44, %v399_v43  ;;  %v383_v47 = vrot.slane %v382_v45, 2  ;;  %v447_v43 = vld [vmem:[%s2174_s3 + $0x40] sm:$0xff]  ;;  %1571 = vmatpush3.msra.mxu0 %v450_v40 }
 0x1d3   :  { %v443_v44 = vld [vmem:[%s2174_s3 + $0x20] sm:$0xff]  ;;  %1572 = vmatprep.subr.mxu0 %v447_v43 }
 0x1d4   :  { %v384_v48 = vadd.f32 %v383_v47, %v382_v45  ;;  %v402_v49 = vrot.slane %v401_v46, 2  ;;  %v442_v45 = vld [vmem:[%s2174_s3 + $0x18] sm:$0xff]  ;;  %v440_v47 = vld [vmem:[%s2174_s3 + $0x8] sm:$0xff]  ;;  %516 = vmatprep.subr.mxu1 %v443_v44  ;;  %1573 = vmatpush3.msra.mxu0 %v447_v43 }
 0x1d5   :  { %517 = vmatpush1.msra.mxu1 %v442_v45 }
 0x1d6   :  { %v385_v50 = vrot.slane %v384_v48, 1  ;;  %v403_v51 = vadd.f32 %v402_v49, %v401_v46  ;;  %v444_v46 = vld [vmem:[%s2174_s3 + $0x28] sm:$0xff]  ;;  %v441_v49 = vld [vmem:[%s2174_s3 + $0x10] sm:$0xff]  ;;  %518 = vmatprep.subr.mxu1 %v440_v47 }
 0x1d7   :  { %1574 = vmatprep.subr.mxu0 %v444_v46 }
 0x1d8   :  { %v386_v52 = vadd.f32 %v385_v50, %v384_v48  ;;  %v404_v53 = vrot.slane %v403_v51, 1  ;;  %v439_v48 = vld [vmem:[%s2174_s3] sm:$0xff]  ;;  %1575 = vmatpush3.msra.mxu0 %v444_v46 }
 0x1d9   :  { %519 = vmatpush1.msra.mxu1 %v439_v48  ;;  %1576 = vmatprep.subr.mxu0 %v441_v49 }
 0x1da   :  { %387 = vrot.lane.b32.xlu0 %v386_v52, %s1779_s2  ;;  %v405_v54 = vadd.f32 %v404_v53, %v403_v51  ;;  %1577 = vmatpush3.msra.mxu0 %v441_v49 }
 0x1db   :  { %1581 = vmatprep.subr.mxu1 %v1778_v0 }
 0x1de   :  { %406 = vrot.lane.b32.xlu0 %v405_v54, %s1779_s2  ;;  %s1781_s2 = smov 64  }
 0x24c   :  { %v388_v55 = vpop.permute.xlu0 %387 }
 0x24d   :  { %v389_v56 = vadd.f32 %v388_v55, %v386_v52 }
 0x24f   :  { %390 = vrot.lane.b32.xlu1 %v389_v56, %s1780_s24 }
 0x250   :  { %v407_v57 = vpop.permute.xlu0 %406 }
 0x251   :  { %v408_v58 = vadd.f32 %v407_v57, %v405_v54 }
 0x253   :  { %409 = vrot.lane.b32.xlu1 %v408_v58, %s1780_s24 }
 0x2c1   :  { %v391_v2 = vpop.permute.xlu1 %390 }
 0x2c2   :  { %v1924_v4 = vadd.f32 %v391_v2, %v389_v56  ;;  %v422_v2 = vld [vmem:[%s2179_s8] sm:$0x1] }
 0x2c4   :  { %393 = vrot.lane.b32.xlu0 %v1924_v4, %s1781_s2 }
 0x2c5   :  { %v410_v10 = vpop.permute.xlu1 %409 }
 0x2c6   :  { %v1946_v12 = vadd.f32 %v410_v10, %v408_v58 }
 0x2c8   :  { %412 = vrot.lane.b32.xlu1 %v1946_v12, %s1781_s2 }
 0x336   :  { %v394_v50 = vpop.permute.xlu0 %393 }
 0x337   :  { %v395_v51 = vadd.f32 %v394_v50, %v1924_v4 }
 0x339   :  { %v396_v52 = vmul.f32 0.0078125, %v395_v51 }
 0x33a   :  { %v413_v53 = vpop.permute.xlu1 %412 }
 0x33b   :  { %v414_v54 = vadd.f32 %v413_v53, %v1946_v12  ;;  %v416_v55 = vmul.f32 %v396_v52, %v396_v52 }
 0x33d   :  { %v415_v56 = vmul.f32 0.0078125, %v414_v54 }
 0x33f   :  { %v417_v57 = vsub.f32 %v415_v56, %v416_v55 }
 0x341   :  { %v419_v58 = vadd.f32 1e-05, %v417_v57 }
 0x343   :  { %1658 = vrsqrt.f32 %v419_v58 }
 0x350   :  { %v1659_v63 = vpop.eup %1658 }
 0x351   :  { %v421_v1 = vmul.f32 %v1659_v63, %v418_v61 }
 0x353   :  { %v423_v3 = vmul.f32 %v421_v1, %v396_v52  ;;  %v428_v4 = vrot.slane %v421_v1, %v2064_v62 }
 0x355   :  { %v424_v5 = vsub.f32 %v422_v2, %v423_v3  ;;  %v429_v6 = vmul.f32 %v428_v4, %v1893_v38  ;;  %v430_v8 = vmul.f32 %v1891_v37, %v428_v4 }
 0x357   :  { %v434_v7 = vrot.slane %v424_v5, %v2064_v62 }
 0x359   :  { %v435_v9 = vadd.f32 %v434_v7, %v429_v6  ;;  %v436_v10 = vadd.f32 %v434_v7, %v430_v8 }
 0x35b   :  { %v437_v11 = vmax.f32 %v435_v9, 0.0  ;;  %v438_v12 = vmax.f32 %v436_v10, 0.0 }
 0x35d   :  { %553 = vmatmul.mubr.f32.vlgmr.msra.gmra.mxu1 %v437_v11  ;;  %1578 = vmatprep.mubr.f32.mxu0 %v437_v11 }
 0x35e   :  { %1579 = vmatmul.mubr.f32.vlgmr.msra.gmra.mxu0 %v438_v12  ;;  %558 = vmatprep.mubr.f32.mxu1 %v1778_v0 }
 0x361   :  { %559 = vmatmul.mubr.f32.gmra.mxu1 %v438_v12 }
 0x362   :  { %1593 = vmatprep.mubr.msk.f32.mxu1 %vm1782_vm2, %v1778_v0 }
 0x41d   :  { %v554_v13 = vpop.f32.mrf.mxu1 }
 0x41e   :  { %v1580_v38 = vpop.f32.mrf.mxu0 }
 0x41f   :  { %v556_v14 = vpop.f32.mrf.mxu1  ;;  %1582 = vmatpush3.msra.mxu1 %v1580_v38 }
 0x420   :  { %v631_v15 = vpop.f32.mrf.mxu0  ;;  %1583 = vmatprep.subr.mxu1 %v1778_v0 }
 0x421   :  { %v560_v37 = vpop.f32.mrf.mxu1  ;;  %1584 = vmatpush3.msra.mxu1 %v631_v15 }
 0x422   :  { %1585 = vmatprep.subr.mxu1 %v1778_v0 }
 0x423   :  { %v562_v16 = vpop.f32.mrf.mxu1 }
 0x424   :  { %1586 = vmatpush3.msra.mxu1 %v562_v16 }
 0x425   :  { %1587 = vmatprep.subr.mxu1 %v1778_v0 }
 0x426   :  { %1588 = vmatpush3.msra.mxu1 %v556_v14 }
 0x427   :  { %1589 = vmatprep.subr.mxu1 %v1778_v0 }
 0x428   :  { %1590 = vmatpush3.msra.mxu1 %v560_v37 }
 0x429   :  { %1591 = vmatprep.subr.mxu1 %v1778_v0 }
 0x42a   :  { %1592 = vmatpush3.msra.mxu1 %v554_v13 }
 0x42b   :  { %1594 = vmatmul.mubr.msk.f32.vlgmr.msra.gmra.mxu1 %vm111_vm0, %v487_v17 }
 0x4eb   :  { %v709_v18 = vpop.f32.mrf.mxu1 }
 0x4ec   :  { %v713_v19 = vrot.slane %v709_v18, 4  ;;  %v726_v20 = vmul.f32 %v709_v18, %v709_v18 }
 0x4ed   :  { %v1595_v21 = vpop.f32.mrf.mxu1 }
 0x4ee   :  { %v714_v22 = vadd.f32 %v713_v19, %v709_v18  ;;  %v727_v23 = vrot.slane %v726_v20, 4 }
 0x4f0   :  { %v715_v24 = vrot.slane %v714_v22, 2  ;;  %v728_v25 = vadd.f32 %v727_v23, %v726_v20 }
 0x4f2   :  { %v716_v26 = vadd.f32 %v715_v24, %v714_v22  ;;  %v729_v27 = vrot.slane %v728_v25, 2 }
 0x4f4   :  { %v717_v28 = vrot.slane %v716_v26, 1  ;;  %v730_v29 = vadd.f32 %v729_v27, %v728_v25 }
 0x4f6   :  { %v718_v30 = vadd.f32 %v717_v28, %v716_v26  ;;  %v731_v31 = vrot.slane %v730_v29, 1 }
 0x4f8   :  { %719 = vrot.lane.b32.xlu0 %v718_v30, %s1780_s24  ;;  %v732_v32 = vadd.f32 %v731_v31, %v730_v29 }
 0x4fa   :  { %733 = vrot.lane.b32.xlu1 %v732_v32, %s1780_s24 }
 0x56a   :  { %v720_v33 = vpop.permute.xlu0 %719 }
 0x56b   :  { %v721_v34 = vadd.f32 %v720_v33, %v718_v30 }
 0x56c   :  { %v734_v35 = vpop.permute.xlu1 %733 }
 0x56d   :  { %v735_v36 = vadd.f32 %v734_v35, %v732_v32  ;;  %722 = vrot.lane.b32.xlu0 %v721_v34, %s1781_s2 }
 0x56f   :  { %736 = vrot.lane.b32.xlu1 %v735_v36, %s1781_s2 }
 0x570   :  { %1723 = shalt.err (!%p1720_p0)  }
 0x571   :  { %74 = dma.hbm_to_vmem [thread:$0]  %s2176_s5, 6144, %s72_s26, [#allocation4] }
 0x572   :  { %s1732_s13 = scalar_lea.vmem %s84_s28, 4096  ;;  %p1737_p2 = scmp.lt.s32.totalorder %s84_s28, %s84_s28 }
 0x573   :  { %p1733_p1 = scmp.ne.s32.totalorder %s84_s28, %s1732_s13  ;;  %p1738_p3 = scmp.lt.s32.totalorder %s1732_s13, %s1732_s13 }
 0x575   :  { %p1739_p4 = por %p1738_p3, %p1737_p2 }
 0x577   :  { %p1740_p5 = pnand %p1739_p4, %p1733_p1 }
 0x579   :  { %1743 = shalt.err (!%p1740_p5)  }
 0x57a   :  { %86 = dma.hbm_to_vmem [thread:$0]  %s2181_s10, 4096, %s84_s28, [#allocation4 + $0x1]  ;;  %v742_v48 = vld [vmem:[%s2178_s7 + $0x1] sm:$0x1] }
 0x57b   :  { %v746_v51 = vld [vmem:[%s2179_s8 + $0x1] sm:$0x1] }
 0x5df   :  { %v723_v39 = vpop.permute.xlu0 %722 }
 0x5e0   :  { %v724_v40 = vadd.f32 %v723_v39, %v721_v34 }
 0x5e1   :  { %v737_v41 = vpop.permute.xlu1 %736 }
 0x5e2   :  { %v725_v42 = vmul.f32 0.03125, %v724_v40  ;;  %v738_v43 = vadd.f32 %v737_v41, %v735_v36 }
 0x5e4   :  { %v740_v44 = vmul.f32 %v725_v42, %v725_v42  ;;  %v739_v45 = vmul.f32 0.03125, %v738_v43 }
 0x5e6   :  { %v741_v46 = vsub.f32 %v739_v45, %v740_v44 }
 0x5e8   :  { %v743_v47 = vadd.f32 1e-05, %v741_v46 }
 0x5ea   :  { %1660 = vrsqrt.f32 %v743_v47 }
 0x5f7   :  { %v1661_v49 = vpop.eup %1660 }
 0x5f8   :  { %v745_v50 = vmul.f32 %v1661_v49, %v742_v48 }
 0x5fa   :  { %v747_v52 = vmul.f32 %v745_v50, %v725_v42  ;;  %v752_v53 = vrot.slane %v745_v50, %v2064_v62 }
 0x5fc   :  { %v748_v54 = vsub.f32 %v746_v51, %v747_v52  ;;  %v753_v55 = vmul.f32 %v752_v53, %v709_v18 }
 0x5fe   :  { %v757_v56 = vrot.slane %v748_v54, %v2064_v62 }
 0x600   :  { %v2103_v57 = vadd.f32 %v757_v56, %v753_v55 }
 0x602   :  { %v759_v58 = vmax.f32 %v2103_v57, 0.0 }
 0x603   :  { %1768 = dma.done.wait [#allocation4], 6144 }
 0x604   :  { %1769 = vsyncadd [#allocation4], 4294961152  ;;  %1596 = vmatprep.subr.mxu0 %v1778_v0  ;;  %1628 = vmatprep.mubr.msk.f32.mxu0 %vm1782_vm2, %v1778_v0  ;;  %v810_v59 = vld [vmem:[#allocation2 + $0x170] sm:$0xff]  ;;  %v811_v61 = vld [vmem:[#allocation2 + $0x178] sm:$0xff]  ;;  %vm954_vm3 = vcmask 195584   ;;  %vm1028_vm4 = vcmask 1043456  }
 0x605   :  { %877 = vmatprep.mubr.f32.mxu1 %v1778_v0  ;;  %v809_v63 = vld [vmem:[#allocation2 + $0x168] sm:$0xff]  ;;  %813 = vmatprep.subr.mxu1 %v810_v59  ;;  %v807_v1 = vld [vmem:[#allocation2 + $0x158] sm:$0xff]  ;;  %v808_v2 = vld [vmem:[#allocation2 + $0x160] sm:$0xff]  ;;  %vm1073_vm5 = vcmask 31744  }
 0x606   :  { %1597 = vmatpush3.msra.mxu0 %v811_v61  ;;  %v806_v3 = vld [vmem:[#allocation2 + $0x150] sm:$0xff]  ;;  %814 = vmatpush1.msra.mxu1 %v809_v63  ;;  %v804_v4 = vld [vmem:[#allocation2 + $0x140] sm:$0xff]  ;;  %v805_v5 = vld [vmem:[#allocation2 + $0x148] sm:$0xff] }
 0x607   :  { %1598 = vmatprep.subr.mxu0 %v1778_v0  ;;  %815 = vmatprep.subr.mxu1 %v807_v1  ;;  %v803_v6 = vld [vmem:[#allocation2 + $0x138] sm:$0xff]  ;;  %v801_v7 = vld [vmem:[#allocation2 + $0x128] sm:$0xff]  ;;  %v802_v8 = vld [vmem:[#allocation2 + $0x130] sm:$0xff] }
 0x608   :  { %1599 = vmatpush3.msra.mxu0 %v808_v2  ;;  %816 = vmatpush1.msra.mxu1 %v806_v3  ;;  %v800_v9 = vld [vmem:[#allocation2 + $0x120] sm:$0xff]  ;;  %v798_v10 = vld [vmem:[#allocation2 + $0x110] sm:$0xff]  ;;  %v799_v11 = vld [vmem:[#allocation2 + $0x118] sm:$0xff] }
 0x609   :  { %1600 = vmatprep.subr.mxu0 %v1778_v0  ;;  %817 = vmatprep.subr.mxu1 %v804_v4  ;;  %v797_v12 = vld [vmem:[#allocation2 + $0x108] sm:$0xff]  ;;  %v795_v13 = vld [vmem:[#allocation2 + $0xf8] sm:$0xff]  ;;  %v796_v38 = vld [vmem:[#allocation2 + $0x100] sm:$0xff] }
 0x60a   :  { %1601 = vmatpush3.msra.mxu0 %v805_v5  ;;  %818 = vmatpush1.msra.mxu1 %v803_v6  ;;  %v794_v14 = vld [vmem:[#allocation2 + $0xf0] sm:$0xff]  ;;  %v792_v15 = vld [vmem:[#allocation2 + $0xe0] sm:$0xff]  ;;  %v793_v37 = vld [vmem:[#allocation2 + $0xe8] sm:$0xff] }
 0x60b   :  { %1602 = vmatprep.subr.mxu0 %v1778_v0  ;;  %819 = vmatprep.subr.mxu1 %v801_v7  ;;  %v791_v16 = vld [vmem:[#allocation2 + $0xd8] sm:$0xff]  ;;  %v789_v17 = vld [vmem:[#allocation2 + $0xc8] sm:$0xff]  ;;  %v790_v18 = vld [vmem:[#allocation2 + $0xd0] sm:$0xff] }
 0x60c   :  { %1603 = vmatpush3.msra.mxu0 %v802_v8  ;;  %820 = vmatpush1.msra.mxu1 %v800_v9  ;;  %v788_v19 = vld [vmem:[#allocation2 + $0xc0] sm:$0xff]  ;;  %v786_v20 = vld [vmem:[#allocation2 + $0xb0] sm:$0xff]  ;;  %v787_v21 = vld [vmem:[#allocation2 + $0xb8] sm:$0xff] }
 0x60d   :  { %1604 = vmatprep.subr.mxu0 %v1778_v0  ;;  %821 = vmatprep.subr.mxu1 %v798_v10  ;;  %v785_v22 = vld [vmem:[#allocation2 + $0xa8] sm:$0xff]  ;;  %v783_v23 = vld [vmem:[#allocation2 + $0x98] sm:$0xff]  ;;  %v784_v24 = vld [vmem:[#allocation2 + $0xa0] sm:$0xff] }
 0x60e   :  { %1605 = vmatpush3.msra.mxu0 %v799_v11  ;;  %822 = vmatpush1.msra.mxu1 %v797_v12  ;;  %v782_v25 = vld [vmem:[#allocation2 + $0x90] sm:$0xff]  ;;  %v780_v26 = vld [vmem:[#allocation2 + $0x80] sm:$0xff]  ;;  %v781_v27 = vld [vmem:[#allocation2 + $0x88] sm:$0xff] }
 0x60f   :  { %1606 = vmatprep.subr.mxu0 %v1778_v0  ;;  %823 = vmatprep.subr.mxu1 %v795_v13  ;;  %v779_v28 = vld [vmem:[#allocation2 + $0x78] sm:$0xff]  ;;  %v777_v29 = vld [vmem:[#allocation2 + $0x68] sm:$0xff]  ;;  %v778_v30 = vld [vmem:[#allocation2 + $0x70] sm:$0xff] }
 0x610   :  { %1607 = vmatpush3.msra.mxu0 %v796_v38  ;;  %824 = vmatpush1.msra.mxu1 %v794_v14  ;;  %v776_v31 = vld [vmem:[#allocation2 + $0x60] sm:$0xff]  ;;  %v774_v32 = vld [vmem:[#allocation2 + $0x50] sm:$0xff]  ;;  %v775_v33 = vld [vmem:[#allocation2 + $0x58] sm:$0xff] }
 0x611   :  { %1608 = vmatprep.subr.mxu0 %v1778_v0  ;;  %825 = vmatprep.subr.mxu1 %v792_v15  ;;  %v773_v34 = vld [vmem:[#allocation2 + $0x48] sm:$0xff]  ;;  %v771_v35 = vld [vmem:[#allocation2 + $0x38] sm:$0xff]  ;;  %v772_v36 = vld [vmem:[#allocation2 + $0x40] sm:$0xff] }
 0x612   :  { %1609 = vmatpush3.msra.mxu0 %v793_v37  ;;  %826 = vmatpush1.msra.mxu1 %v791_v16  ;;  %v770_v39 = vld [vmem:[#allocation2 + $0x30] sm:$0xff]  ;;  %v768_v40 = vld [vmem:[#allocation2 + $0x20] sm:$0xff]  ;;  %v769_v41 = vld [vmem:[#allocation2 + $0x28] sm:$0xff] }
 0x613   :  { %1610 = vmatprep.subr.mxu0 %v1778_v0  ;;  %827 = vmatprep.subr.mxu1 %v789_v17  ;;  %v767_v42 = vld [vmem:[#allocation2 + $0x18] sm:$0xff]  ;;  %v765_v43 = vld [vmem:[#allocation2 + $0x8] sm:$0xff]  ;;  %v766_v44 = vld [vmem:[#allocation2 + $0x10] sm:$0xff] }
 0x614   :  { %1611 = vmatpush3.msra.mxu0 %v790_v18  ;;  %828 = vmatpush1.msra.mxu1 %v788_v19  ;;  %v764_v45 = vld [vmem:[#allocation2] sm:$0xff] }
 0x615   :  { %1612 = vmatprep.subr.mxu0 %v1778_v0  ;;  %829 = vmatprep.subr.mxu1 %v786_v20  ;;  %v812_v50 = vld [vmem:[%s2177_s6] sm:$0xf] }
 0x616   :  { %1613 = vmatpush3.msra.mxu0 %v787_v21  ;;  %830 = vmatpush1.msra.mxu1 %v785_v22  ;;  %v1054_v15 = vld [vmem:[%s2178_s7 + $0x2] sm:$0x1] }
 0x617   :  { %1614 = vmatprep.subr.mxu0 %v1778_v0  ;;  %831 = vmatprep.subr.mxu1 %v783_v23  ;;  %v1058_v17 = vld [vmem:[%s2179_s8 + $0x2] sm:$0x1] }
 0x618   :  { %1615 = vmatpush3.msra.mxu0 %v784_v24  ;;  %832 = vmatpush1.msra.mxu1 %v782_v25  ;;  %v1072_v25 = vld [vmem:[%s2180_s9] sm:$0x3] }
 0x619   :  { %1616 = vmatprep.subr.mxu0 %v1778_v0  ;;  %833 = vmatprep.subr.mxu1 %v780_v26 }
 0x61a   :  { %1617 = vmatpush3.msra.mxu0 %v781_v27  ;;  %834 = vmatpush1.msra.mxu1 %v779_v28 }
 0x61b   :  { %1618 = vmatprep.subr.mxu0 %v1778_v0  ;;  %835 = vmatprep.subr.mxu1 %v777_v29 }
 0x61c   :  { %1619 = vmatpush3.msra.mxu0 %v778_v30  ;;  %836 = vmatpush1.msra.mxu1 %v776_v31 }
 0x61d   :  { %1620 = vmatprep.subr.mxu0 %v1778_v0  ;;  %837 = vmatprep.subr.mxu1 %v774_v32 }
 0x61e   :  { %1621 = vmatpush3.msra.mxu0 %v775_v33  ;;  %838 = vmatpush1.msra.mxu1 %v773_v34 }
 0x61f   :  { %1622 = vmatprep.subr.mxu0 %v1778_v0  ;;  %839 = vmatprep.subr.mxu1 %v771_v35 }
 0x620   :  { %1623 = vmatpush3.msra.mxu0 %v772_v36  ;;  %840 = vmatpush1.msra.mxu1 %v770_v39 }
 0x621   :  { %1624 = vmatprep.subr.mxu0 %v1778_v0  ;;  %841 = vmatprep.subr.mxu1 %v768_v40 }
 0x622   :  { %1625 = vmatpush3.msra.mxu0 %v769_v41  ;;  %842 = vmatpush1.msra.mxu1 %v767_v42 }
 0x623   :  { %1626 = vmatprep.subr.mxu0 %v1778_v0  ;;  %843 = vmatprep.subr.mxu1 %v765_v43 }
 0x624   :  { %1627 = vmatpush3.msra.mxu0 %v766_v44  ;;  %844 = vmatpush1.msra.mxu1 %v764_v45 }
 0x625   :  { %1629 = vmatmul.mubr.f32.vlgmr.msra.gmra.mxu0 %v759_v58  ;;  %878 = vmatmul.mubr.f32.vlgmr.msra.gmra.mxu1 %v759_v58 }
 0x626   :  { %1631 = vmatprep.subr.mxu1 %v1778_v0  ;;  %1637 = vmatprep.mubr.msk.f32.mxu1 %vm1782_vm2, %v1778_v0 }
 0x6e5   :  { %v950_v46 = vpop.f32.mrf.mxu0  ;;  %v879_v47 = vpop.f32.mrf.mxu1 }
 0x6e6   :  { %1632 = vmatpush3.msra.mxu1 %v950_v46 }
 0x6e7   :  { %v1630_v48 = vpop.f32.mrf.mxu0  ;;  %1633 = vmatprep.subr.mxu1 %v1778_v0  ;;  %v881_v49 = vpop.f32.mrf.mxu1 }
 0x6e8   :  { %1634 = vmatpush3.msra.mxu1 %v881_v49 }
 0x6e9   :  { %1635 = vmatprep.subr.mxu1 %v1778_v0 }
 0x6ea   :  { %1636 = vmatpush3.msra.mxu1 %v879_v47 }
 0x6eb   :  { %1638 = vmatmul.mubr.msk.f32.vlgmr.msra.gmra.mxu1 %vm954_vm3, %v812_v50  ;;  %1640 = vmatprep.subr.mxu1 %v1778_v0 }
 0x6ec   :  { %1642 = vmatprep.mubr.msk.f32.mxu1 %vm1782_vm2, %v1778_v0 }
 0x7ab   :  { %v1024_v51 = vpop.f32.mrf.mxu1 }
 0x7ac   :  { %v1029_v52 = vsel %vm1028_vm4, %v1024_v51, 0.0  ;;  %v1040_v53 = vmul.f32 %v1024_v51, %v1024_v51 }
 0x7ad   :  { %v1030_v54 = vrot.slane %v1029_v52, 4  ;;  %v1639_v55 = vpop.f32.mrf.mxu1 }
 0x7ae   :  { %v1041_v56 = vsel %vm1028_vm4, %v1040_v53, 0.0 }
 0x7af   :  { %v1031_v57 = vadd.f32 %v1030_v54, %v1029_v52  ;;  %v1042_v58 = vrot.slane %v1041_v56, 4 }
 0x7b1   :  { %v1032_v59 = vrot.slane %v1031_v57, 2  ;;  %v1043_v61 = vadd.f32 %v1042_v58, %v1041_v56 }
 0x7b3   :  { %v1033_v63 = vadd.f32 %v1032_v59, %v1031_v57  ;;  %v1044_v1 = vrot.slane %v1043_v61, 2 }
 0x7b5   :  { %v1034_v2 = vrot.slane %v1033_v63, 1  ;;  %v1045_v3 = vadd.f32 %v1044_v1, %v1043_v61 }
 0x7b7   :  { %v1035_v4 = vadd.f32 %v1034_v2, %v1033_v63  ;;  %v1046_v5 = vrot.slane %v1045_v3, 1 }
 0x7b9   :  { %1036 = vrot.lane.b32.xlu0 %v1035_v4, %s1781_s2  ;;  %v1047_v6 = vadd.f32 %v1046_v5, %v1045_v3 }
 0x7bd   :  { %1048 = vrot.lane.b32.xlu0 %v1047_v6, %s1781_s2 }
 0x82b   :  { %v1037_v7 = vpop.permute.xlu0 %1036 }
 0x82c   :  { %v1038_v8 = vadd.f32 %v1037_v7, %v1035_v4 }
 0x82e   :  { %v1039_v9 = vmul.f32 0.125, %v1038_v8 }
 0x82f   :  { %v1049_v10 = vpop.permute.xlu0 %1048 }
 0x830   :  { %v1050_v11 = vadd.f32 %v1049_v10, %v1047_v6  ;;  %v1052_v12 = vmul.f32 %v1039_v9, %v1039_v9 }
 0x832   :  { %v1051_v13 = vmul.f32 0.125, %v1050_v11 }
 0x834   :  { %v1053_v38 = vsub.f32 %v1051_v13, %v1052_v12 }
 0x836   :  { %v1055_v14 = vadd.f32 1e-05, %v1053_v38 }
 0x838   :  { %1662 = vrsqrt.f32 %v1055_v14 }
 0x845   :  { %v1663_v37 = vpop.eup %1662 }
 0x846   :  { %v1057_v16 = vmul.f32 %v1663_v37, %v1054_v15 }
 0x848   :  { %v1059_v18 = vmul.f32 %v1057_v16, %v1039_v9  ;;  %v1064_v19 = vrot.slane %v1057_v16, %v2064_v62 }
 0x84a   :  { %v1060_v20 = vsub.f32 %v1058_v17, %v1059_v18  ;;  %v1065_v21 = vmul.f32 %v1064_v19, %v1024_v51 }
 0x84c   :  { %v1069_v22 = vrot.slane %v1060_v20, %v2064_v62 }
 0x84e   :  { %v1070_v23 = vadd.f32 %v1069_v22, %v1065_v21 }
 0x850   :  { %v1071_v24 = vmax.f32 %v1070_v23, 0.0 }
 0x852   :  { %1641 = vmatpush3.msk.msra.mxu1 %vm1028_vm4, %v1071_v24 }
 0x853   :  { %1643 = vmatmul.mubr.msk.f32.vlgmr.msra.gmra.mxu1 %vm1073_vm5, %v1072_v25 }
 0x913   :  { %v1146_v26 = vpop.f32.mrf.mxu1 }
 0x914   :  { %1151 = vrot.lane.b32.xlu1 %v1146_v26, %s1781_s2 }
 0x915   :  { %v1644_v27 = vpop.f32.mrf.mxu1 }
 0x986   :  { %v1152_v28 = vpop.permute.xlu1 %1151 }
 0x987   :  { %v2157_v29 = vadd.f32 %v1152_v28, %v1146_v26 }
 0x988   :  { %1770 = dma.done.wait [#allocation4 + $0x1], 4096 }
 0x989   :  { %1771 = vsyncadd [#allocation4 + $0x1], 4294963200  ;;  %1281 = vmatprep.mubr.f32.mxu1 %v1778_v0  ;;  %1352 = vmatprep.mubr.f32.mxu0 %v1778_v0  ;;  %v1188_v30 = vld [vmem:[#allocation3 + $0xe8] sm:$0xff]  ;;  %v1190_v31 = vld [vmem:[#allocation3 + $0xf8] sm:$0xff]  ;;  %vm1213_vm6 = vcmask 523264   ;;  %v1203_v4 = vsub.s32 2, %v2058_v60 }
 0x98a   :  { %v1187_v32 = vld [vmem:[#allocation3 + $0xe0] sm:$0xff]  ;;  %1233 = vmatprep.subr.mxu1 %v1188_v30  ;;  %1304 = vmatprep.subr.mxu0 %v1190_v31  ;;  %v1189_v33 = vld [vmem:[#allocation3 + $0xf0] sm:$0xff]  ;;  %v1184_v34 = vld [vmem:[#allocation3 + $0xc8] sm:$0xff]  ;;  %v1785_v2 = vmov 1983009808   ;;  %v1199_v5 = vsub.s32 1, %v2058_v60 }
 0x98b   :  { %v1186_v35 = vld [vmem:[#allocation3 + $0xd8] sm:$0xff]  ;;  %1234 = vmatpush1.msra.mxu1 %v1187_v32  ;;  %1305 = vmatpush1.msra.mxu0 %v1189_v33  ;;  %v1183_v36 = vld [vmem:[#allocation3 + $0xc0] sm:$0xff]  ;;  %v1185_v39 = vld [vmem:[#allocation3 + $0xd0] sm:$0xff]  ;;  %v1366_v3 = vunpack.c.l.s4 %v1785_v2  ;;  %v1207_v6 = vsub.s32 3, %v2058_v60  ;;  %s1786_s7 = smov [#allocation10]  }
 0x98c   :  { %v1180_v40 = vld [vmem:[#allocation3 + $0xa8] sm:$0xff]  ;;  %1235 = vmatprep.subr.mxu1 %v1184_v34  ;;  %1306 = vmatprep.subr.mxu0 %v1186_v35  ;;  %v1182_v41 = vld [vmem:[#allocation3 + $0xb8] sm:$0xff]  ;;  %v1179_v42 = vld [vmem:[#allocation3 + $0xa0] sm:$0xff]  ;;  %s1388_s8 = sshll.u32 %s1786_s7, 4  ;;  %s1389_s8 = int_to_ptr.vmem [resolvable:$true] %s1388_s8 }
 0x98d   :  { %v1181_v43 = vld [vmem:[#allocation3 + $0xb0] sm:$0xff]  ;;  %1236 = vmatpush1.msra.mxu1 %v1183_v36  ;;  %1307 = vmatpush1.msra.mxu0 %v1185_v39  ;;  %v1176_v0 = vld [vmem:[#allocation3 + $0x88] sm:$0xff]  ;;  %v1178_v44 = vld [vmem:[#allocation3 + $0x98] sm:$0xff]  ;;  %v1367_v8 = vunpack.c.0.s8 %v1366_v3  ;;  %s1744_s9 = scalar_lea.vmem %s1389_s8, 128  ;;  %p1749_p7 = scmp.lt.s32.totalorder %s1389_s8, %s1389_s8 }
 0x98e   :  { %1237 = vmatprep.subr.mxu1 %v1180_v40  ;;  %1308 = vmatprep.subr.mxu0 %v1182_v41  ;;  %v1175_v45 = vld [vmem:[#allocation3 + $0x80] sm:$0xff]  ;;  %v1177_v46 = vld [vmem:[#allocation3 + $0x90] sm:$0xff]  ;;  %v1172_v47 = vld [vmem:[#allocation3 + $0x68] sm:$0xff]  ;;  %p1745_p6 = scmp.ne.s32.totalorder %s1389_s8, %s1744_s9  ;;  %p1750_p8 = scmp.lt.s32.totalorder %s1744_s9, %s1744_s9 }
 0x98f   :  { %1238 = vmatpush1.msra.mxu1 %v1179_v42  ;;  %1309 = vmatpush1.msra.mxu0 %v1181_v43  ;;  %v1174_v48 = vld [vmem:[#allocation3 + $0x78] sm:$0xff]  ;;  %v1171_v49 = vld [vmem:[#allocation3 + $0x60] sm:$0xff]  ;;  %v1173_v50 = vld [vmem:[#allocation3 + $0x70] sm:$0xff]  ;;  %v1370_v15 = vsub.s32 %v1367_v8, %v2058_v60 }
 0x990   :  { %1239 = vmatprep.subr.mxu1 %v1176_v0  ;;  %1310 = vmatprep.subr.mxu0 %v1178_v44  ;;  %v1168_v51 = vld [vmem:[#allocation3 + $0x48] sm:$0xff]  ;;  %v1170_v52 = vld [vmem:[#allocation3 + $0x58] sm:$0xff]  ;;  %v1167_v53 = vld [vmem:[#allocation3 + $0x40] sm:$0xff]  ;;  %p1751_p9 = por %p1750_p8, %p1749_p7 }
 0x991   :  { %1240 = vmatpush1.msra.mxu1 %v1175_v45  ;;  %1311 = vmatpush1.msra.mxu0 %v1177_v46  ;;  %v1169_v54 = vld [vmem:[#allocation3 + $0x50] sm:$0xff]  ;;  %v1164_v55 = vld [vmem:[#allocation3 + $0x28] sm:$0xff]  ;;  %v1166_v56 = vld [vmem:[#allocation3 + $0x38] sm:$0xff] }
 0x992   :  { %1241 = vmatprep.subr.mxu1 %v1172_v47  ;;  %1312 = vmatprep.subr.mxu0 %v1174_v48  ;;  %v1163_v57 = vld [vmem:[#allocation3 + $0x20] sm:$0xff]  ;;  %v1165_v58 = vld [vmem:[#allocation3 + $0x30] sm:$0xff]  ;;  %v1160_v59 = vld [vmem:[#allocation3 + $0x8] sm:$0xff]  ;;  %p1752_p10 = pnand %p1751_p9, %p1745_p6 }
 0x993   :  { %1242 = vmatpush1.msra.mxu1 %v1171_v49  ;;  %1313 = vmatpush1.msra.mxu0 %v1173_v50  ;;  %v1162_v61 = vld [vmem:[#allocation3 + $0x18] sm:$0xff]  ;;  %v1159_v63 = vld [vmem:[#allocation3] sm:$0xff]  ;;  %v1161_v1 = vld [vmem:[#allocation3 + $0x10] sm:$0xff] }
 0x994   :  { %1243 = vmatprep.subr.mxu1 %v1168_v51  ;;  %1314 = vmatprep.subr.mxu0 %v1170_v52  ;;  %v1191_v7 = vld [vmem:[#allocation8] sm:$0xf] }
 0x995   :  { %1244 = vmatpush1.msra.mxu1 %v1167_v53  ;;  %1315 = vmatpush1.msra.mxu0 %v1169_v54  ;;  %v1196_v9 = vrot.slane %v1191_v7, %v2064_v62  ;;  %v1204_v10 = vrot.slane %v1191_v7, %v1203_v4  ;;  %v1200_v11 = vrot.slane %v1191_v7, %v1199_v5 }
 0x996   :  { %1245 = vmatprep.subr.mxu1 %v1164_v55  ;;  %1316 = vmatprep.subr.mxu0 %v1166_v56  ;;  %v1208_v12 = vrot.slane %v1191_v7, %v1207_v6 }
 0x997   :  { %1246 = vmatpush1.msra.mxu1 %v1163_v57  ;;  %1317 = vmatpush1.msra.mxu0 %v1165_v58 }
 0x998   :  { %1247 = vmatprep.subr.mxu1 %v1160_v59  ;;  %1318 = vmatprep.subr.mxu0 %v1162_v61 }
 0x999   :  { %1248 = vmatpush1.msra.mxu1 %v1159_v63  ;;  %1319 = vmatpush1.msra.mxu0 %v1161_v1 }
 0x99a   :  { %1425 = vmatmul.mubr.msk.f32.vlgmr.msra.gmra.mxu1 %vm1213_vm6, %v2157_v29  ;;  %1426 = vmatmul.mubr.msk.f32.vlgmr.msra.gmra.mxu0 %vm1213_vm6, %v2157_v29 }
 0xa5a   :  { %v1283_v13 = vpop.f32.mrf.mxu1  ;;  %v1354_v38 = vpop.f32.mrf.mxu0 }
 0xa5b   :  { %v1284_v16 = vadd.f32 %v1283_v13, %v1196_v9  ;;  %v1355_v17 = vadd.f32 %v1354_v38, %v1204_v10 }
 0xa5c   :  { %v1285_v14 = vpop.f32.mrf.mxu1  ;;  %v1356_v37 = vpop.f32.mrf.mxu0 }
 0xa5d   :  { %v1286_v18 = vadd.f32 %v1285_v14, %v1200_v11  ;;  %v1357_v19 = vadd.f32 %v1356_v37, %v1208_v12 }
 0xa5f   :  { %v1363_v20 = vcombine.low %v1284_v16, %v1286_v18  ;;  %v1364_v21 = vcombine.low %v1355_v17, %v1357_v19 }
 0xa61   :  { %v1371_v22 = vrot.slane %v1363_v20, %v1370_v15  ;;  %v1378_v23 = vrot.slane %v1364_v21, %v1370_v15 }
 0xa63   :  { %v1379_v62 = vcombine.low %v1371_v22, %v1378_v23 }
 0xa65   :  { %1381 = vst [vmem:[#allocation10] sm:$0xff] %v1379_v62 }
 0xa66   :  { %1755 = shalt.err (!%p1752_p10)
}
 0xa67   :  { %1391 = dma.vmem_to_hbm [thread:$0]  %s1389_s8, 128, %s2183_s12, [#allocation7]  }
 0xa68   :  { %1772 = dma.done.wait [#allocation7], 128  }
 0xa69   :  { %1773 = vsyncadd [#allocation7], 4294967168 }
 0xa6a   :  { %1395 = vsyncpa [#allocation6], 1 }
 0xa6b   :  { %1396 = vsyncpa [#allocation9], 1 }
 0xa6c   :  { %1397 = vsyncpa [#allocation7], 1 }
 0xa6d   :  { %1398 = vsyncmov [#allocation4] }
 0xa70   :  { %s1399_s0 = vpop.sfrf %1398 }
 0xa71   :  { %p1427_p11 = scmp.ne.s32.totalorder %s1399_s0, 0 }
 0xa73   :  { %1403 = shalt.err (%p1427_p11)  }
 0xa74   :  { %1405 = vsyncmov [#allocation4 + $0x1] }
 0xa77   :  { %s1406_s23 = vpop.sfrf %1405 }
 0xa78   :  { %p1428_p12 = scmp.ne.s32.totalorder %s1406_s23, 0 }
 0xa7a   :  { %1410 = shalt.err (%p1428_p12)  }

</bundles_post_ra>
